<compile_context>
chip_gen: v7x
topology: tpu7x:2x2x1
jax: 0.10.0
libtpu: 0.0.40
codegen_flags: <defaults>
</compile_context>

<pallas_src>
import functools

import jax
import jax.numpy as jnp
from jax.experimental import pallas as pl
from jax.experimental.pallas import tpu as pltpu


# ----------------------------------------------------------------------------
# Fused kernel: linear1 + (folded linear2/conv/D2S) + LeakyReLU
# ----------------------------------------------------------------------------
def _inter_kernel(x_ref, w1_ref, b1_ref, wf_ref, bf_ref, o_ref):
    # x_ref : (TB, IN)   bf16
    # w1_ref: (IN, MID)  bf16     b1_ref: (1, MID)  f32
    # wf_ref: (MID, TN)  bf16     bf_ref: (1, TN)   f32
    # o_ref : (TB, TN)   f32   (columns already in D2S NHWC (ho, wo, oc) order)
    h1 = jnp.dot(x_ref[...], w1_ref[...],
                 preferred_element_type=jnp.float32) + b1_ref[...]
    y = jnp.dot(h1.astype(jnp.bfloat16), wf_ref[...],
                preferred_element_type=jnp.float32) + bf_ref[...]
    # LeakyReLU(0.1) — elementwise, so applying it after the D2S column
    # permutation (already baked into wf/bf) is exact.
    o_ref[...] = jnp.where(y > 0.0, y, 0.1 * y).astype(o_ref.dtype)


# ----------------------------------------------------------------------------
# Tile-size heuristics
# ----------------------------------------------------------------------------
def _pick_block_b(B, cap=256):
    # M >= 256 fills the v6e/v7x MXU rows (128 already saturates v5e); for
    # small B just take the whole batch in one step.  Large B yields >= 2 grid
    # programs so both v7x TensorCores get work.
    return B if B <= cap else cap


def _pick_block_n(lout, cap=8192):
    # Column tile of the fused weight: bounds the double-buffered VMEM weight
    # tile (important on v7x: 64 MiB physical / 32 MiB scoped default) when
    # out_res / out_ch grow.  Must be a multiple of 128 unless it is the full
    # width (cap=8192 satisfies this).
    return lout if lout <= cap else cap


# ----------------------------------------------------------------------------
# One-time parameter preparation (review item #5: hoisted out of the forward)
#
# linear2 -> reshape -> zero-pad -> 3x3 conv -> (D2S permutation) is a single
# affine map of h1; we recover its matrix/bias exactly (in f32) by evaluating
# the reference tail on the identity basis, with output columns ordered as the
# Depth2Space NHWC layout (ho, wo, oc).  This is an exact algebraic refactor
# of the module (there is no nonlinearity between linear2 and the conv).
# ----------------------------------------------------------------------------
def prepare_inter_params(params, *, out_ch, out_res, scale=2):
    MID = params["w1"].shape[0]
    OC, HR, WR, S = out_ch, out_res, out_res, scale
    HO, WO = HR * S, WR * S

    def tail_affine(h1):  # (N, MID) f32 -> pre-activation D2S output (N, HO*WO*OC) f32
        h2 = h1 @ params["w2"].T + params["b2"]
        img = h2.reshape(-1, OC, HR, WR)
        imgp = jnp.pad(img, ((0, 0), (0, 0), (1, 1), (1, 1)))        # same pad = 1
        y = jax.lax.conv_general_dilated(
            imgp, params["wc"], window_strides=(1, 1), padding="VALID",
            dimension_numbers=("NCHW", "OIHW", "NCHW"))
        y = y + params["bc"].reshape(1, -1, 1, 1)                    # (N, C2, HR, WR)
        n = h1.shape[0]
        # torch Depth2Space: c2 = s1*S*OC + s2*OC + oc
        y = y.reshape(n, S, S, OC, HR, WR).transpose(0, 3, 4, 1, 5, 2)
        y = y.reshape(n, OC, HO, WO)                                 # NCHW
        return y.transpose(0, 2, 3, 1).reshape(n, HO * WO * OC)      # NHWC-flat

    bf = tail_affine(jnp.zeros((1, MID), jnp.float32))               # (1, LOUT)
    wf = tail_affine(jnp.eye(MID, dtype=jnp.float32)) - bf           # (MID, LOUT)

    return {
        "w1": params["w1"].T.astype(jnp.bfloat16),                   # (IN, MID)
        "b1": params["b1"].reshape(1, -1).astype(jnp.float32),       # (1, MID)
        "wf": wf.astype(jnp.bfloat16),                               # (MID, LOUT)
        "bf": bf.astype(jnp.float32),                                # (1, LOUT)
    }


# ----------------------------------------------------------------------------
# Forward: (B, in_ch) f32 -> (B, out_ch, out_res*scale, out_res*scale) f32
# ----------------------------------------------------------------------------
def inter_forward(x, prep, *, out_ch, out_res, scale=2, block_b=None, block_n=None):
    B, IN = x.shape
    MID = prep["w1"].shape[1]
    OC, HR, S = out_ch, out_res, scale
    HO = WO = HR * S
    LOUT = HO * WO * OC

    TB = block_b if block_b is not None else _pick_block_b(B)
    TN = block_n if block_n is not None else _pick_block_n(LOUT)

    xb = x.astype(jnp.bfloat16)

    out_flat = pl.pallas_call(
        _inter_kernel,
        out_shape=jax.ShapeDtypeStruct((B, LOUT), jnp.float32),
        grid=(pl.cdiv(B, TB), pl.cdiv(LOUT, TN)),
        in_specs=[
            pl.BlockSpec((TB, IN), lambda i, j: (i, 0)),
            pl.BlockSpec((IN, MID), lambda i, j: (0, 0)),
            pl.BlockSpec((1, MID), lambda i, j: (0, 0)),
            pl.BlockSpec((MID, TN), lambda i, j: (0, j)),
            pl.BlockSpec((1, TN), lambda i, j: (0, j)),
        ],
        out_specs=pl.BlockSpec((TB, TN), lambda i, j: (i, j)),
        compiler_params=pltpu.CompilerParams(
            dimension_semantics=("parallel", "parallel")),
    )(xb, prep["w1"], prep["b1"], prep["wf"], prep["bf"])

    # Lane-dense NHWC-flat kernel output -> NCHW (torch layout).
    return out_flat.reshape(B, HO, WO, OC).transpose(0, 3, 1, 2)


# ----------------------------------------------------------------------------
# Pure-JAX f32 reference (mirrors the PyTorch module op-for-op)
# ----------------------------------------------------------------------------
def inter_forward_ref(x, params, *, out_ch, out_res, scale=2):
    h = x @ params["w1"].T + params["b1"]
    h = h @ params["w2"].T + params["b2"]
    B = x.shape[0]
    img = h.reshape(B, out_ch, out_res, out_res)
    imgp = jnp.pad(img, ((0, 0), (0, 0), (1, 1), (1, 1)))
    y = jax.lax.conv_general_dilated(
        imgp, params["wc"], window_strides=(1, 1), padding="VALID",
        dimension_numbers=("NCHW", "OIHW", "NCHW"))
    y = y + params["bc"].reshape(1, -1, 1, 1)
    y = jnp.where(y > 0, y, 0.1 * y)
    b, c, hh, ww = y.shape
    oc = c // (scale * scale)
    y = y.reshape(b, scale, scale, oc, hh, ww)          # torch Depth2Space order
    y = y.transpose(0, 3, 4, 1, 5, 2)
    return y.reshape(b, oc, hh * scale, ww * scale)


# ----------------------------------------------------------------------------
# Deterministic synthetic parameters (torch layouts)
# ----------------------------------------------------------------------------
def init_inter_params(key, in_ch, mid_ch, out_ch, out_res, scale=2):
    k1, k2, k3, k4, k5, k6 = jax.random.split(key, 6)
    s = 0.1
    lin2_out = out_res * out_res * out_ch
    c2 = out_ch * scale * scale
    return {
        "w1": jax.random.normal(k1, (mid_ch, in_ch), jnp.float32) * s,
        "b1": jax.random.normal(k2, (mid_ch,), jnp.float32) * s,
        "w2": jax.random.normal(k3, (lin2_out, mid_ch), jnp.float32) * s,
        "b2": jax.random.normal(k4, (lin2_out,), jnp.float32) * s,
        "wc": jax.random.normal(k5, (c2, out_ch, 3, 3), jnp.float32) * s,
        "bc": jax.random.normal(k6, (c2,), jnp.float32) * s,
    }


# ----------------------------------------------------------------------------
if __name__ == "__main__":
    B, in_ch, mid_ch, out_ch, out_res = 2, 64, 128, 16, 8

    key = jax.random.PRNGKey(0)
    params = init_inter_params(key, in_ch, mid_ch, out_ch, out_res)
    x = jax.random.normal(jax.random.fold_in(key, 7), (B, in_ch), jnp.float32)

    # One-time, init-path parameter preparation (NOT in the per-forward path).
    prep = prepare_inter_params(params, out_ch=out_ch, out_res=out_res)

    fwd = jax.jit(functools.partial(inter_forward, out_ch=out_ch,
                                    out_res=out_res))
    out = jax.block_until_ready(fwd(x, prep))

    assert out.shape == (B, out_ch, out_res * 2, out_res * 2), out.shape

    # bf16 MXU inputs => inference-grade accuracy vs the f32 reference.
    ref = inter_forward_ref(x, params, out_ch=out_ch, out_res=out_res)
    err = float(jnp.max(jnp.abs(out - ref)))
    assert err < 0.15, f"max abs err vs f32 reference too large: {err}"

    print("KERNEL_OK")
</pallas_src>

<mosaic_0001>
module attributes {stable_mosaic.version = 11 : i64} {
  func.func @_inter_kernel(%arg0: i32, %arg1: i32, %arg2: memref<2x64xbf16, #tpu.memory_space<vmem>>, %arg3: memref<64x128xbf16, #tpu.memory_space<vmem>>, %arg4: memref<1x128xf32, #tpu.memory_space<vmem>>, %arg5: memref<128x4096xbf16, #tpu.memory_space<vmem>>, %arg6: memref<1x4096xf32, #tpu.memory_space<vmem>>, %arg7: memref<2x4096xf32, #tpu.memory_space<vmem>>) attributes {dimension_semantics = [#tpu.dimension_semantics<parallel>, #tpu.dimension_semantics<parallel>], iteration_bounds = array<i64: 1, 1>, scalar_prefetch = 0 : i64, scratch_operands = 0 : i64, tpu.core_type = #tpu.core_type<tc>, window_params = [{transform_indices = @transform_0, window_bounds = array<i64: 2, 64>}, {pipeline_mode = #tpu.pipeline_mode<synchronous>, transform_indices = @transform_1, window_bounds = array<i64: 64, 128>}, {pipeline_mode = #tpu.pipeline_mode<synchronous>, transform_indices = @transform_2, window_bounds = array<i64: 1, 128>}, {transform_indices = @transform_3, window_bounds = array<i64: 128, 4096>}, {transform_indices = @transform_4, window_bounds = array<i64: 1, 4096>}, {transform_indices = @transform_5, window_bounds = array<i64: 2, 4096>}]} {
    %c0 = arith.constant 0 : index
    %c0_0 = arith.constant 0 : index
    %0 = vector.load %arg2[%c0, %c0_0] : memref<2x64xbf16, #tpu.memory_space<vmem>>, vector<2x64xbf16>
    %c0_1 = arith.constant 0 : index
    %c0_2 = arith.constant 0 : index
    %1 = vector.load %arg3[%c0_1, %c0_2] : memref<64x128xbf16, #tpu.memory_space<vmem>>, vector<64x128xbf16>
    %cst = arith.constant dense<0.000000e+00> : vector<2x128xf32>
    %2 = tpu.matmul %0, %1, %cst {dimension_numbers = #tpu.dot_dimension_numbers<[1], [0], [0], [1], [0, 0, 1, 1], [], []>} : vector<2x64xbf16>, vector<64x128xbf16>, vector<2x128xf32> -> vector<2x128xf32>
    %c0_3 = arith.constant 0 : index
    %c0_4 = arith.constant 0 : index
    %3 = vector.load %arg4[%c0_3, %c0_4] : memref<1x128xf32, #tpu.memory_space<vmem>>, vector<1x128xf32>
    %4 = vector.broadcast %3 : vector<1x128xf32> to vector<2x128xf32>
    %5 = arith.addf %2, %4 : vector<2x128xf32>
    %6 = arith.truncf %5 : vector<2x128xf32> to vector<2x128xbf16>
    %c0_5 = arith.constant 0 : index
    %c0_6 = arith.constant 0 : index
    %7 = vector.load %arg5[%c0_5, %c0_6] : memref<128x4096xbf16, #tpu.memory_space<vmem>>, vector<128x4096xbf16>
    %cst_7 = arith.constant dense<0.000000e+00> : vector<2x4096xf32>
    %8 = tpu.matmul %6, %7, %cst_7 {dimension_numbers = #tpu.dot_dimension_numbers<[1], [0], [0], [1], [0, 0, 1, 1], [], []>} : vector<2x128xbf16>, vector<128x4096xbf16>, vector<2x4096xf32> -> vector<2x4096xf32>
    %c0_8 = arith.constant 0 : index
    %c0_9 = arith.constant 0 : index
    %9 = vector.load %arg6[%c0_8, %c0_9] : memref<1x4096xf32, #tpu.memory_space<vmem>>, vector<1x4096xf32>
    %10 = vector.broadcast %9 : vector<1x4096xf32> to vector<2x4096xf32>
    %11 = arith.addf %8, %10 : vector<2x4096xf32>
    %cst_10 = arith.constant 0.000000e+00 : f32
    %12 = vector.broadcast %cst_10 : f32 to vector<2x4096xf32>
    %13 = arith.cmpf ogt, %11, %12 : vector<2x4096xf32>
    %cst_11 = arith.constant 1.000000e-01 : f32
    %14 = vector.broadcast %cst_11 : f32 to vector<2x4096xf32>
    %15 = arith.mulf %14, %11 : vector<2x4096xf32>
    %16 = arith.select %13, %11, %15 : vector<2x4096xi1>, vector<2x4096xf32>
    %c0_12 = arith.constant 0 : index
    %c0_13 = arith.constant 0 : index
    %17 = vector.load %arg7[%c0_12, %c0_13] : memref<2x4096xf32, #tpu.memory_space<vmem>>, vector<2x4096xf32>
    tpu.vector_store %arg7[%c0_12, %c0_13], %16 {strides = array<i32>} : memref<2x4096xf32, #tpu.memory_space<vmem>>, vector<2x4096xf32>,
    return
  }
  func.func @transform_0(%arg0: i32, %arg1: i32) -> (i32, i32) {
    %c0_i32 = arith.constant 0 : i32
    %c0_i32_0 = arith.constant 0 : i32
    return %arg0, %c0_i32 : i32, i32
  }
  func.func @transform_1(%arg0: i32, %arg1: i32) -> (i32, i32) {
    %c0_i32 = arith.constant 0 : i32
    %c0_i32_0 = arith.constant 0 : i32
    %c0_i32_1 = arith.constant 0 : i32
    return %c0_i32, %c0_i32_0 : i32, i32
  }
  func.func @transform_2(%arg0: i32, %arg1: i32) -> (i32, i32) {
    %c0_i32 = arith.constant 0 : i32
    %c0_i32_0 = arith.constant 0 : i32
    %c0_i32_1 = arith.constant 0 : i32
    return %c0_i32, %c0_i32_0 : i32, i32
  }
  func.func @transform_3(%arg0: i32, %arg1: i32) -> (i32, i32) {
    %c0_i32 = arith.constant 0 : i32
    %c0_i32_0 = arith.constant 0 : i32
    return %c0_i32, %arg1 : i32, i32
  }
  func.func @transform_4(%arg0: i32, %arg1: i32) -> (i32, i32) {
    %c0_i32 = arith.constant 0 : i32
    %c0_i32_0 = arith.constant 0 : i32
    return %c0_i32, %arg1 : i32, i32
  }
  func.func @transform_5(%arg0: i32, %arg1: i32) -> (i32, i32) {
    %c0_i32 = arith.constant 0 : i32
    return %arg0, %arg1 : i32, i32
  }
}

</mosaic_0001>

<bundles_post_ra>
// kernel: inter_forward.1
= control target key start
LH: loop header
LB: loop body
LE: loop exit
PB: predicated region body
PF: predicated region fallthrough
CT: control target
= control target key end

     0   :  { %10 = vsyncpa [#allocation3], 0  ;;  %s3383_s0 = inlined_call_operand.vmem [shape: bf16[2,64], index: 0, kind: input, shape index: {}]   ;;  %s3384_s1 = inlined_call_operand.hbm [shape: bf16[64,128], index: 1, kind: input, shape index: {}]   ;;  %s3385_s2 = inlined_call_operand.vmem [shape: f32[1,128], index: 2, kind: input, shape index: {}]   ;;  %s3386_s3 = inlined_call_operand.hbm [shape: bf16[128,4096], index: 3, kind: input, shape index: {}]   ;;  %s3387_s4 = inlined_call_operand.hbm [shape: f32[1,4096], index: 4, kind: input, shape index: {}]   ;;  %s3388_s5 = inlined_call_operand.vmem [shape: f32[2,4096], index: 5, kind: output, shape index: {}]  }
   0x1   :  { %11 = vsyncpa [#allocation5], 0  ;;  %s3155_s18 = smov [#allocation4]   ;;  %s3085_s22 = scalar_lea.hbm %s3386_s3, 32768 }
   0x2   :  { %s33_s19 = sshll.u32 %s3155_s18, 4  ;;  %p3086_p0 = scmp.ne.s32.totalorder %s3386_s3, %s3085_s22  ;;  %s34_s19 = int_to_ptr.vmem [resolvable:$true] %s33_s19 }
   0x3   :  { %p3089_p1 = scmp.lt.u32.totalorder %s3085_s22, %s3386_s3 }
   0x5   :  { %p3091_p2 = pnand %p3089_p1, %p3086_p0 }
   0x7   :  { %3094 = shalt.err (!%p3091_p2)
}
   0x8   :  { %s3095_s27 = scalar_lea.vmem %s34_s19, 32768  ;;  %p3100_p4 = scmp.lt.s32.totalorder %s34_s19, %s34_s19 }
   0x9   :  { %p3096_p3 = scmp.ne.s32.totalorder %s34_s19, %s3095_s27  ;;  %p3101_p5 = scmp.lt.s32.totalorder %s3095_s27, %s3095_s27 }
   0xb   :  { %p3102_p6 = por %p3101_p5, %p3100_p4 }
   0xd   :  { %p3103_p7 = pnand %p3102_p6, %p3096_p3 }
   0xf   :  { %3106 = shalt.err (!%p3103_p7)
}
  0x10   :  { %s3156_s28 = smov 2048   ;;  %s3157_s29 = smov 128  }
  0x11   :  { %39 = dma.hbm_to_vmem [thread:$0]  %s3386_s3, 32768, %s34_s19, [#allocation5], %s3156_s28, %s3156_s28, %s3157_s29  }
  0x12   :  { %s3158_s7 = smov [#allocation2]   ;;  %s3107_s11 = scalar_lea.hbm %s3384_s1, 512 }
  0x13   :  { %s19_s8 = sshll.u32 %s3158_s7, 4  ;;  %p3108_p8 = scmp.ne.s32.totalorder %s3384_s1, %s3107_s11  ;;  %s20_s8 = int_to_ptr.vmem [resolvable:$true] %s19_s8 }
  0x14   :  { %p3111_p9 = scmp.lt.u32.totalorder %s3107_s11, %s3384_s1 }
  0x16   :  { %p3113_p10 = pnand %p3111_p9, %p3108_p8 }
  0x18   :  { %3116 = shalt.err (!%p3113_p10)
}
  0x19   :  { %s3117_s16 = scalar_lea.vmem %s20_s8, 512  ;;  %p3122_p12 = scmp.lt.s32.totalorder %s20_s8, %s20_s8 }
  0x1a   :  { %p3118_p11 = scmp.ne.s32.totalorder %s20_s8, %s3117_s16  ;;  %p3123_p13 = scmp.lt.s32.totalorder %s3117_s16, %s3117_s16 }
  0x1c   :  { %p3124_p0 = por %p3123_p13, %p3122_p12 }
  0x1e   :  { %p3125_p1 = pnand %p3124_p0, %p3118_p11 }
  0x20   :  { %3128 = shalt.err (!%p3125_p1)
}
  0x21   :  { %s3159_s3 = smov 64   ;;  %s3160_s17 = smov 4  }
  0x22   :  { %25 = dma.hbm_to_vmem [thread:$0]  %s3384_s1, 512, %s20_s8, [#allocation3], %s3159_s3, %s3159_s3, %s3160_s17  }
  0x23   :  { %s3161_s20 = smov [#allocation6]   ;;  %s3129_s24 = scalar_lea.hbm %s3387_s4, 512 }
  0x24   :  { %s46_s21 = sshll.u32 %s3161_s20, 4  ;;  %p3130_p2 = scmp.ne.s32.totalorder %s3387_s4, %s3129_s24  ;;  %s47_s21 = int_to_ptr.vmem [resolvable:$true] %s46_s21 }
  0x25   :  { %p3133_p3 = scmp.lt.u32.totalorder %s3129_s24, %s3387_s4 }
  0x27   :  { %p3135_p4 = pnand %p3133_p3, %p3130_p2 }
  0x29   :  { %3138 = shalt.err (!%p3135_p4)
}
  0x2a   :  { %s3139_s29 = scalar_lea.vmem %s47_s21, 512  ;;  %p3144_p6 = scmp.lt.s32.totalorder %s47_s21, %s47_s21 }
  0x2b   :  { %p3140_p5 = scmp.ne.s32.totalorder %s47_s21, %s3139_s29  ;;  %p3145_p7 = scmp.lt.s32.totalorder %s3139_s29, %s3139_s29 }
  0x2d   :  { %p3146_p8 = por %p3145_p7, %p3144_p6 }
  0x2f   :  { %p3147_p9 = pnand %p3146_p8, %p3140_p5 }
  0x31   :  { %3150 = shalt.err (!%p3147_p9)
}
  0x32   :  { %49 = dma.hbm_to_vmem [thread:$0]  %s3387_s4, 512, %s47_s21, [#allocation5]  }
  0x33   :  { %3151 = dma.done.wait [#allocation3], 512  }
  0x34   :  { %3152 = vsyncadd [#allocation3], 4294966784 }
  0x35   :  { %3153 = dma.done.wait [#allocation5], 33280  }
  0x36   :  { %3154 = vsyncadd [#allocation5], 4294934016  ;;  %v3162_v0 = vmov 0.0   ;;  %vm3163_vm0 = vmmov 0   ;;  %v3081_v1 = vld [vmem:[#allocation2] sm:$0xff]   ;;  %v3082_v2 = vld [vmem:[#allocation2 + $0x8] sm:$0xff]  }
  0x37   :  { %3058 = vmatprep.subr.bf16.mxu0 %v3162_v0  ;;  %3066 = vmatprep.mubr.msk.bf16.mxu0 %vm3163_vm0, %v3162_v0  ;;  %v145_v3 = vld [vmem:[#allocation4] sm:$0xff]  ;;  %v3083_v8 = vld [vmem:[#allocation2 + $0x10] sm:$0xff]   ;;  %v146_v13 = vld [vmem:[#allocation4 + $0x8] sm:$0xff]  ;;  %vm100_vm1 = vcmask 523264  }
  0x38   :  { %3059 = vmatpush3.bf16.msra.mxu0 %v3081_v1  ;;  %v161_v4 = vld [vmem:[#allocation4 + $0x80] sm:$0xff]  ;;  %v162_v14 = vld [vmem:[#allocation4 + $0x88] sm:$0xff]  ;;  %v3084_v17 = vld [vmem:[#allocation2 + $0x18] sm:$0xff]  }
  0x39   :  { %3060 = vmatprep.subr.bf16.mxu0 %v3162_v0  ;;  %v2798_v5 = vcombine.high %v145_v3, %v161_v4  ;;  %v2797_v6 = vcombine.low %v145_v3, %v161_v4  ;;  %v177_v7 = vld [vmem:[#allocation4 + $0x100] sm:$0xff]  ;;  %v2800_v20 = vcombine.high %v146_v13, %v162_v14  ;;  %v178_v21 = vld [vmem:[#allocation4 + $0x108] sm:$0xff]  ;;  %v2799_v26 = vcombine.low %v146_v13, %v162_v14 }
  0x3a   :  { %v193_v9 = vld [vmem:[#allocation4 + $0x180] sm:$0xff]  ;;  %v194_v22 = vld [vmem:[#allocation4 + $0x188] sm:$0xff]  ;;  %v3164_v14 = vmov 0  }
  0x3b   :  { %1849 = vmatprep.subr.bf16.mxu1 %v2798_v5  ;;  %v2830_v10 = vcombine.high %v177_v7, %v193_v9  ;;  %v209_v11 = vld [vmem:[#allocation4 + $0x200] sm:$0xff]  ;;  %v2829_v15 = vcombine.low %v177_v7, %v193_v9  ;;  %v2832_v29 = vcombine.high %v178_v21, %v194_v22  ;;  %v210_v30 = vld [vmem:[#allocation4 + $0x208] sm:$0xff]  ;;  %v2831_v34 = vcombine.low %v178_v21, %v194_v22  ;;  %v163_v7 = vld [vmem:[#allocation4 + $0x90] sm:$0xff] }
  0x3c   :  { %3061 = vmatpush3.bf16.msra.mxu0 %v3082_v2  ;;  %v225_v12 = vld [vmem:[#allocation4 + $0x280] sm:$0xff]  ;;  %1850 = vmatpush1.bf16.msra.mxu1 %v2797_v6  ;;  %v226_v31 = vld [vmem:[#allocation4 + $0x288] sm:$0xff]  ;;  %v147_v6 = vld [vmem:[#allocation4 + $0x10] sm:$0xff] }
  0x3d   :  { %3062 = vmatprep.subr.bf16.mxu0 %v3162_v0  ;;  %1851 = vmatprep.subr.bf16.mxu1 %v2830_v10  ;;  %v2862_v16 = vcombine.high %v209_v11, %v225_v12  ;;  %v241_v18 = vld [vmem:[#allocation4 + $0x300] sm:$0xff]  ;;  %v2861_v23 = vcombine.low %v209_v11, %v225_v12  ;;  %v2864_v37 = vcombine.high %v210_v30, %v226_v31  ;;  %v242_v38 = vld [vmem:[#allocation4 + $0x308] sm:$0xff]  ;;  %v164_v10 = vld [vmem:[#allocation4 + $0x98] sm:$0xff] }
  0x3e   :  { %v257_v19 = vld [vmem:[#allocation4 + $0x380] sm:$0xff]  ;;  %v258_v39 = vld [vmem:[#allocation4 + $0x388] sm:$0xff]  ;;  %v2863_v42 = vcombine.low %v210_v30, %v226_v31  ;;  %v2802_v9 = vcombine.high %v147_v6, %v163_v7  ;;  %v2801_v11 = vcombine.low %v147_v6, %v163_v7  ;;  %1881 = vmatprep.mubr.bf16.mxu1 %v3164_v14  ;;  %v212_v30 = vld [vmem:[#allocation4 + $0x218] sm:$0xff] }
  0x3f   :  { %v2894_v24 = vcombine.high %v241_v18, %v257_v19  ;;  %v60_v25 = vld [vmem:[%s3383_s0] sm:$0x1]  ;;  %v2893_v32 = vcombine.low %v241_v18, %v257_v19  ;;  %v2896_v45 = vcombine.high %v242_v38, %v258_v39  ;;  %v274_v46 = vld [vmem:[#allocation4 + $0x408] sm:$0xff]  ;;  %v2895_v50 = vcombine.low %v242_v38, %v258_v39  ;;  %v195_v18 = vld [vmem:[#allocation4 + $0x190] sm:$0xff] }
  0x40   :  { %3063 = vmatpush3.bf16.msra.mxu0 %v3083_v8  ;;  %1852 = vmatpush1.bf16.msra.mxu1 %v2829_v15  ;;  %v273_v27 = vld [vmem:[#allocation4 + $0x400] sm:$0xff]  ;;  %v290_v47 = vld [vmem:[#allocation4 + $0x488] sm:$0xff]  ;;  %v148_v8 = vld [vmem:[#allocation4 + $0x18] sm:$0xff] }
  0x41   :  { %3064 = vmatprep.subr.bf16.mxu0 %v3162_v0  ;;  %1853 = vmatprep.subr.bf16.mxu1 %v2862_v16  ;;  %v289_v28 = vld [vmem:[#allocation4 + $0x480] sm:$0xff]  ;;  %v2928_v51 = vcombine.high %v274_v46, %v290_v47  ;;  %v306_v52 = vld [vmem:[#allocation4 + $0x508] sm:$0xff]  ;;  %v2927_v55 = vcombine.low %v274_v46, %v290_v47  ;;  %v2803_v12 = vcombine.low %v148_v8, %v164_v10  ;;  %v179_v16 = vld [vmem:[#allocation4 + $0x110] sm:$0xff] }
  0x42   :  { %v2926_v33 = vcombine.high %v273_v27, %v289_v28  ;;  %v305_v35 = vld [vmem:[#allocation4 + $0x500] sm:$0xff]  ;;  %v2925_v40 = vcombine.low %v273_v27, %v289_v28  ;;  %v322_v53 = vld [vmem:[#allocation4 + $0x588] sm:$0xff]  ;;  %v2804_v13 = vcombine.high %v148_v8, %v164_v10  ;;  %v180_v19 = vld [vmem:[#allocation4 + $0x118] sm:$0xff] }
  0x43   :  { %v321_v36 = vld [vmem:[#allocation4 + $0x580] sm:$0xff]  ;;  %v2960_v56 = vcombine.high %v306_v52, %v322_v53  ;;  %v338_v57 = vld [vmem:[#allocation4 + $0x608] sm:$0xff]  ;;  %v2959_v59 = vcombine.low %v306_v52, %v322_v53  ;;  %v211_v28 = vld [vmem:[#allocation4 + $0x210] sm:$0xff] }
  0x44   :  { %3065 = vmatpush3.bf16.msra.mxu0 %v3084_v17  ;;  %1854 = vmatpush1.bf16.msra.mxu1 %v2861_v23  ;;  %v2958_v41 = vcombine.high %v305_v35, %v321_v36  ;;  %v337_v43 = vld [vmem:[#allocation4 + $0x600] sm:$0xff]  ;;  %v2957_v48 = vcombine.low %v305_v35, %v321_v36  ;;  %v354_v58 = vld [vmem:[#allocation4 + $0x688] sm:$0xff]  ;;  %v228_v31 = vld [vmem:[#allocation4 + $0x298] sm:$0xff] }
  0x45   :  { %1890 = vmatprep.subr.bf16.mxu0 %v2800_v20  ;;  %1855 = vmatprep.subr.bf16.mxu1 %v2894_v24  ;;  %v353_v44 = vld [vmem:[#allocation4 + $0x680] sm:$0xff]  ;;  %v2992_v60 = vcombine.high %v338_v57, %v354_v58  ;;  %v2991_v61 = vcombine.low %v338_v57, %v354_v58  ;;  %v370_v0 = vld [vmem:[#allocation4 + $0x708] sm:$0xff]  ;;  %v196_v20 = vld [vmem:[#allocation4 + $0x198] sm:$0xff]  ;;  %v2868_v35 = vcombine.high %v212_v30, %v228_v31 }
  0x46   :  { %v2990_v49 = vcombine.high %v337_v43, %v353_v44  ;;  %v2989_v54 = vcombine.low %v337_v43, %v353_v44  ;;  %v369_v62 = vld [vmem:[#allocation4 + $0x700] sm:$0xff]  ;;  %v386_v2 = vld [vmem:[#allocation4 + $0x788] sm:$0xff]  ;;  %v2836_v27 = vcombine.high %v180_v19, %v196_v20  ;;  %v243_v36 = vld [vmem:[#allocation4 + $0x310] sm:$0xff] }
  0x47   :  { %3067 = vmatmul.mubr.msk.bf16.vlgmr.msra.gmra.mrb[0].mxu0 %vm100_vm1, %v60_v25  ;;  %v385_v63 = vld [vmem:[#allocation4 + $0x780] sm:$0xff]  ;;  %v3023_v3 = vcombine.low %v370_v0, %v386_v2  ;;  %v3024_v4 = vcombine.high %v370_v0, %v386_v2  ;;  %v244_v38 = vld [vmem:[#allocation4 + $0x318] sm:$0xff]  ;;  %v275_v44 = vld [vmem:[#allocation4 + $0x410] sm:$0xff] }
  0x48   :  { %1891 = vmatpush1.bf16.msra.mxu0 %v2799_v26  ;;  %1856 = vmatpush1.bf16.msra.mxu1 %v2893_v32  ;;  %v3022_v1 = vcombine.high %v369_v62, %v385_v63  ;;  %v3021_v5 = vcombine.low %v369_v62, %v385_v63  ;;  %v2791_v15 = vld [vmem:[%s3385_s2] ss:$0 sm:$0xff]  ;;  %v2834_v26 = vcombine.high %v179_v16, %v195_v18  ;;  %v260_v39 = vld [vmem:[#allocation4 + $0x398] sm:$0xff]  ;;  %v307_v52 = vld [vmem:[#allocation4 + $0x510] sm:$0xff] }
  0x49   :  { %1892 = vmatprep.subr.bf16.mxu0 %v2832_v29  ;;  %1857 = vmatprep.subr.bf16.mxu1 %v2926_v33  ;;  %v227_v29 = vld [vmem:[#allocation4 + $0x290] sm:$0xff]  ;;  %v2833_v32 = vcombine.low %v179_v16, %v195_v18  ;;  %v2835_v33 = vcombine.low %v180_v19, %v196_v20  ;;  %v2900_v43 = vcombine.high %v244_v38, %v260_v39  ;;  %v276_v46 = vld [vmem:[#allocation4 + $0x418] sm:$0xff]  ;;  %v166_v16 = vld [vmem:[#allocation4 + $0xa8] sm:$0xff] }
  0x4a   :  { %1922 = vmatprep.mubr.bf16.mxu0 %v3164_v14  ;;  %v292_v47 = vld [vmem:[#allocation4 + $0x498] sm:$0xff]  ;;  %v323_v53 = vld [vmem:[#allocation4 + $0x590] sm:$0xff] }
  0x4b   :  { %v2931_v57 = vcombine.low %v276_v46, %v292_v47  ;;  %v2962_v58 = vcombine.high %v307_v52, %v323_v53  ;;  %v340_v62 = vld [vmem:[#allocation4 + $0x618] sm:$0xff]  ;;  %v2961_v0 = vcombine.low %v307_v52, %v323_v53 }
  0x4c   :  { %1893 = vmatpush1.bf16.msra.mxu0 %v2831_v34  ;;  %1858 = vmatpush1.bf16.msra.mxu1 %v2925_v40  ;;  %v2866_v34 = vcombine.high %v211_v28, %v227_v29  ;;  %v2865_v40 = vcombine.low %v211_v28, %v227_v29  ;;  %v356_v63 = vld [vmem:[#allocation4 + $0x698] sm:$0xff] }
  0x4d   :  { %1894 = vmatprep.subr.bf16.mxu0 %v2864_v37  ;;  %1859 = vmatprep.subr.bf16.mxu1 %v2958_v41  ;;  %v259_v37 = vld [vmem:[#allocation4 + $0x390] sm:$0xff]  ;;  %v2867_v41 = vcombine.low %v212_v30, %v228_v31  ;;  %v372_v6 = vld [vmem:[#allocation4 + $0x718] sm:$0xff]  ;;  %v213_v30 = vld [vmem:[#allocation4 + $0x220] sm:$0xff] }
  0x4e   :  { %v388_v7 = vld [vmem:[#allocation4 + $0x798] sm:$0xff]  ;;  %v229_v31 = vld [vmem:[#allocation4 + $0x2a0] sm:$0xff] }
  0x4f   :  { %v3027_v18 = vcombine.low %v372_v6, %v388_v7 }
  0x50   :  { %1895 = vmatpush1.bf16.msra.mxu0 %v2863_v42  ;;  %1860 = vmatpush1.bf16.msra.mxu1 %v2957_v48  ;;  %v2898_v42 = vcombine.high %v243_v36, %v259_v37  ;;  %v2897_v48 = vcombine.low %v243_v36, %v259_v37  ;;  %v2870_v36 = vcombine.high %v213_v30, %v229_v31 }
  0x51   :  { %1896 = vmatprep.subr.bf16.mxu0 %v2896_v45  ;;  %1861 = vmatprep.subr.bf16.mxu1 %v2990_v49  ;;  %v291_v45 = vld [vmem:[#allocation4 + $0x490] sm:$0xff]  ;;  %v2899_v49 = vcombine.low %v244_v38, %v260_v39  ;;  %v245_v38 = vld [vmem:[#allocation4 + $0x320] sm:$0xff] }
  0x52   :  { %v261_v39 = vld [vmem:[#allocation4 + $0x3a0] sm:$0xff] }
  0x54   :  { %1897 = vmatpush1.bf16.msra.mxu0 %v2895_v50  ;;  %1862 = vmatpush1.bf16.msra.mxu1 %v2989_v54  ;;  %v2930_v50 = vcombine.high %v275_v44, %v291_v45  ;;  %v308_v54 = vld [vmem:[#allocation4 + $0x518] sm:$0xff] }
  0x55   :  { %1898 = vmatprep.subr.bf16.mxu0 %v2928_v51  ;;  %1863 = vmatprep.subr.bf16.mxu1 %v3022_v1  ;;  %v2932_v51 = vcombine.high %v276_v46, %v292_v47  ;;  %v277_v46 = vld [vmem:[#allocation4 + $0x420] sm:$0xff] }
  0x56   :  { %v293_v47 = vld [vmem:[#allocation4 + $0x4a0] sm:$0xff] }
  0x57   :  { %v2934_v52 = vcombine.high %v277_v46, %v293_v47 }
  0x58   :  { %1899 = vmatpush1.bf16.msra.mxu0 %v2927_v55  ;;  %1864 = vmatpush1.bf16.msra.mxu1 %v3021_v5  ;;  %v324_v55 = vld [vmem:[#allocation4 + $0x598] sm:$0xff]  ;;  %v387_v5 = vld [vmem:[#allocation4 + $0x790] sm:$0xff] }
  0x59   :  { %1900 = vmatprep.subr.bf16.mxu0 %v2960_v56  ;;  %1931 = vmatprep.subr.bf16.mxu1 %v2802_v9  ;;  %v2929_v56 = vcombine.low %v275_v44, %v291_v45  ;;  %v2963_v1 = vcombine.low %v308_v54, %v324_v55  ;;  %v2995_v9 = vcombine.low %v340_v62, %v356_v63 }
  0x5a   :  { %v2902_v44 = vcombine.high %v245_v38, %v261_v39 }
  0x5c   :  { %1901 = vmatpush1.bf16.msra.mxu0 %v2959_v59  ;;  %v2964_v59 = vcombine.high %v308_v54, %v324_v55  ;;  %v309_v54 = vld [vmem:[#allocation4 + $0x520] sm:$0xff] }
  0x5d   :  { %1902 = vmatprep.subr.bf16.mxu0 %v2992_v60  ;;  %v339_v60 = vld [vmem:[#allocation4 + $0x610] sm:$0xff]  ;;  %v325_v55 = vld [vmem:[#allocation4 + $0x5a0] sm:$0xff] }
  0x60   :  { %1903 = vmatpush1.bf16.msra.mxu0 %v2991_v61  ;;  %v355_v61 = vld [vmem:[#allocation4 + $0x690] sm:$0xff] }
  0x61   :  { %1904 = vmatprep.subr.bf16.mxu0 %v3024_v4  ;;  %v2994_v2 = vcombine.high %v339_v60, %v355_v61  ;;  %v371_v4 = vld [vmem:[#allocation4 + $0x710] sm:$0xff]  ;;  %v2993_v8 = vcombine.low %v339_v60, %v355_v61  ;;  %v2966_v60 = vcombine.high %v309_v54, %v325_v55 }
  0x62   :  { %v3026_v10 = vcombine.high %v371_v4, %v387_v5 }
  0x64   :  { %1905 = vmatpush1.bf16.msra.mxu0 %v3023_v3  ;;  %v2996_v3 = vcombine.high %v340_v62, %v356_v63  ;;  %v341_v62 = vld [vmem:[#allocation4 + $0x620] sm:$0xff] }
  0x65   :  { %1972 = vmatprep.subr.bf16.mxu0 %v2804_v13  ;;  %v165_v13 = vld [vmem:[#allocation4 + $0xa0] sm:$0xff] }
  0x66   :  { %v357_v63 = vld [vmem:[#allocation4 + $0x6a0] sm:$0xff] }
 0x11a   :  { %v138_v17 = vpop.f32.mrb[0].mxu0 }
 0x11b   :  { %v139_v21 = vadd.f32 %v2791_v15, %v138_v17  ;;  %v3068_v22 = vpop.f32.mrb[1].mxu0  ;;  %v150_v15 = vld [vmem:[#allocation4 + $0x28] sm:$0xff]  ;;  %v3025_v17 = vcombine.low %v371_v4, %v387_v5  ;;  %v2998_v4 = vcombine.high %v341_v62, %v357_v63 }
 0x11c   :  { %v141_v23 = vpop.f32.mrb[2].mxu0  ;;  %v2808_v20 = vcombine.high %v150_v15, %v166_v16  ;;  %v197_v22 = vld [vmem:[#allocation4 + $0x1a0] sm:$0xff] }
 0x11d   :  { %v3240_v24 = vpack.c.bf16 %v139_v21, %v139_v21  ;;  %v3069_v25 = vpop.f32.mrb[3].mxu0  ;;  %v181_v21 = vld [vmem:[#allocation4 + $0x120] sm:$0xff]  ;;  %v182_v23 = vld [vmem:[#allocation4 + $0x128] sm:$0xff] }
 0x11e   :  { %v198_v25 = vld [vmem:[#allocation4 + $0x1a8] sm:$0xff]  ;;  %v2838_v28 = vcombine.high %v181_v21, %v197_v22 }
 0x11f   :  { %1882 = vmatmul.mubr.bf16.vlgmr.msra.gmra.mrb[0].mxu1 %v3240_v24  ;;  %1923 = vmatmul.mubr.bf16.vlgmr.msra.gmra.mrb[4].mxu0 %v3240_v24  ;;  %v2840_v29 = vcombine.high %v182_v23, %v198_v25 }
 0x120   :  { %1932 = vmatpush1.bf16.msra.mxu1 %v2801_v11  ;;  %1973 = vmatpush1.bf16.msra.mxu0 %v2803_v12  ;;  %v3028_v11 = vcombine.high %v372_v6, %v388_v7  ;;  %v149_v12 = vld [vmem:[#allocation4 + $0x20] sm:$0xff] }
 0x121   :  { %1933 = vmatprep.subr.bf16.mxu1 %v2834_v26  ;;  %1974 = vmatprep.subr.bf16.mxu0 %v2836_v27  ;;  %v2806_v19 = vcombine.high %v149_v12, %v165_v13  ;;  %v2805_v26 = vcombine.low %v149_v12, %v165_v13  ;;  %v2807_v27 = vcombine.low %v150_v15, %v166_v16  ;;  %v373_v6 = vld [vmem:[#allocation4 + $0x720] sm:$0xff]  ;;  %v151_v15 = vld [vmem:[#allocation4 + $0x30] sm:$0xff] }
 0x122   :  { %1963 = vmatprep.mubr.bf16.mxu1 %v3164_v14  ;;  %2004 = vmatprep.mubr.bf16.mxu0 %v3164_v14  ;;  %v389_v7 = vld [vmem:[#allocation4 + $0x7a0] sm:$0xff]  ;;  %v167_v16 = vld [vmem:[#allocation4 + $0xb0] sm:$0xff] }
 0x123   :  { %v3030_v12 = vcombine.high %v373_v6, %v389_v7 }
 0x124   :  { %1934 = vmatpush1.bf16.msra.mxu1 %v2833_v32  ;;  %1975 = vmatpush1.bf16.msra.mxu0 %v2835_v33  ;;  %v214_v32 = vld [vmem:[#allocation4 + $0x228] sm:$0xff] }
 0x125   :  { %1935 = vmatprep.subr.bf16.mxu1 %v2866_v34  ;;  %1976 = vmatprep.subr.bf16.mxu0 %v2868_v35  ;;  %v230_v33 = vld [vmem:[#allocation4 + $0x2a8] sm:$0xff]  ;;  %v2837_v34 = vcombine.low %v181_v21, %v197_v22  ;;  %v2839_v35 = vcombine.low %v182_v23, %v198_v25  ;;  %v2810_v21 = vcombine.high %v151_v15, %v167_v16  ;;  %v183_v23 = vld [vmem:[#allocation4 + $0x130] sm:$0xff] }
 0x126   :  { %v2872_v37 = vcombine.high %v214_v32, %v230_v33  ;;  %v199_v25 = vld [vmem:[#allocation4 + $0x1b0] sm:$0xff] }
 0x128   :  { %1936 = vmatpush1.bf16.msra.mxu1 %v2865_v40  ;;  %1977 = vmatpush1.bf16.msra.mxu0 %v2867_v41  ;;  %v246_v40 = vld [vmem:[#allocation4 + $0x328] sm:$0xff] }
 0x129   :  { %1937 = vmatprep.subr.bf16.mxu1 %v2898_v42  ;;  %1978 = vmatprep.subr.bf16.mxu0 %v2900_v43  ;;  %v262_v41 = vld [vmem:[#allocation4 + $0x3a8] sm:$0xff]  ;;  %v2869_v42 = vcombine.low %v213_v30, %v229_v31  ;;  %v2871_v43 = vcombine.low %v214_v32, %v230_v33  ;;  %v2842_v30 = vcombine.high %v183_v23, %v199_v25  ;;  %v215_v32 = vld [vmem:[#allocation4 + $0x230] sm:$0xff] }
 0x12a   :  { %v2904_v45 = vcombine.high %v246_v40, %v262_v41  ;;  %v231_v33 = vld [vmem:[#allocation4 + $0x2b0] sm:$0xff] }
 0x12c   :  { %1938 = vmatpush1.bf16.msra.mxu1 %v2897_v48  ;;  %1979 = vmatpush1.bf16.msra.mxu0 %v2899_v49  ;;  %v278_v48 = vld [vmem:[#allocation4 + $0x428] sm:$0xff] }
 0x12d   :  { %1939 = vmatprep.subr.bf16.mxu1 %v2930_v50  ;;  %1980 = vmatprep.subr.bf16.mxu0 %v2932_v51  ;;  %v294_v49 = vld [vmem:[#allocation4 + $0x4a8] sm:$0xff]  ;;  %v2901_v50 = vcombine.low %v245_v38, %v261_v39  ;;  %v2903_v51 = vcombine.low %v246_v40, %v262_v41  ;;  %v2874_v38 = vcombine.high %v215_v32, %v231_v33  ;;  %v247_v40 = vld [vmem:[#allocation4 + $0x330] sm:$0xff] }
 0x12e   :  { %v2936_v53 = vcombine.high %v278_v48, %v294_v49  ;;  %v263_v41 = vld [vmem:[#allocation4 + $0x3b0] sm:$0xff] }
 0x130   :  { %1940 = vmatpush1.bf16.msra.mxu1 %v2929_v56  ;;  %1981 = vmatpush1.bf16.msra.mxu0 %v2931_v57  ;;  %v310_v56 = vld [vmem:[#allocation4 + $0x528] sm:$0xff] }
 0x131   :  { %1941 = vmatprep.subr.bf16.mxu1 %v2962_v58  ;;  %1982 = vmatprep.subr.bf16.mxu0 %v2964_v59  ;;  %v326_v57 = vld [vmem:[#allocation4 + $0x5a8] sm:$0xff]  ;;  %v2933_v58 = vcombine.low %v277_v46, %v293_v47  ;;  %v2935_v59 = vcombine.low %v278_v48, %v294_v49  ;;  %v2906_v46 = vcombine.high %v247_v40, %v263_v41  ;;  %v279_v48 = vld [vmem:[#allocation4 + $0x430] sm:$0xff] }
 0x132   :  { %v2968_v61 = vcombine.high %v310_v56, %v326_v57  ;;  %v295_v49 = vld [vmem:[#allocation4 + $0x4b0] sm:$0xff] }
 0x134   :  { %1942 = vmatpush1.bf16.msra.mxu1 %v2961_v0  ;;  %1983 = vmatpush1.bf16.msra.mxu0 %v2963_v1  ;;  %v342_v0 = vld [vmem:[#allocation4 + $0x628] sm:$0xff] }
 0x135   :  { %1943 = vmatprep.subr.bf16.mxu1 %v2994_v2  ;;  %1984 = vmatprep.subr.bf16.mxu0 %v2996_v3  ;;  %v358_v1 = vld [vmem:[#allocation4 + $0x6a8] sm:$0xff]  ;;  %v2965_v2 = vcombine.low %v309_v54, %v325_v55  ;;  %v2967_v3 = vcombine.low %v310_v56, %v326_v57  ;;  %v2938_v54 = vcombine.high %v279_v48, %v295_v49  ;;  %v311_v56 = vld [vmem:[#allocation4 + $0x530] sm:$0xff] }
 0x136   :  { %v3000_v5 = vcombine.high %v342_v0, %v358_v1  ;;  %v327_v57 = vld [vmem:[#allocation4 + $0x5b0] sm:$0xff] }
 0x138   :  { %1944 = vmatpush1.bf16.msra.mxu1 %v2993_v8  ;;  %1985 = vmatpush1.bf16.msra.mxu0 %v2995_v9  ;;  %v374_v8 = vld [vmem:[#allocation4 + $0x728] sm:$0xff] }
 0x139   :  { %1945 = vmatprep.subr.bf16.mxu1 %v3026_v10  ;;  %1986 = vmatprep.subr.bf16.mxu0 %v3028_v11  ;;  %v390_v9 = vld [vmem:[#allocation4 + $0x7a8] sm:$0xff]  ;;  %v2997_v10 = vcombine.low %v341_v62, %v357_v63  ;;  %v2999_v11 = vcombine.low %v342_v0, %v358_v1  ;;  %v2970_v62 = vcombine.high %v311_v56, %v327_v57  ;;  %v343_v0 = vld [vmem:[#allocation4 + $0x630] sm:$0xff] }
 0x13a   :  { %v3032_v13 = vcombine.high %v374_v8, %v390_v9  ;;  %v359_v1 = vld [vmem:[#allocation4 + $0x6b0] sm:$0xff] }
 0x13c   :  { %1946 = vmatpush1.bf16.msra.mxu1 %v3025_v17  ;;  %1987 = vmatpush1.bf16.msra.mxu0 %v3027_v18  ;;  %v152_v17 = vld [vmem:[#allocation4 + $0x38] sm:$0xff] }
 0x13d   :  { %2013 = vmatprep.subr.bf16.mxu1 %v2806_v19  ;;  %2054 = vmatprep.subr.bf16.mxu0 %v2808_v20  ;;  %v168_v18 = vld [vmem:[#allocation4 + $0xb8] sm:$0xff]  ;;  %v3029_v19 = vcombine.low %v373_v6, %v389_v7  ;;  %v3031_v20 = vcombine.low %v374_v8, %v390_v9  ;;  %v3002_v6 = vcombine.high %v343_v0, %v359_v1  ;;  %v375_v8 = vld [vmem:[#allocation4 + $0x730] sm:$0xff] }
 0x13e   :  { %v2812_v22 = vcombine.high %v152_v17, %v168_v18  ;;  %v391_v9 = vld [vmem:[#allocation4 + $0x7b0] sm:$0xff] }
 0x13f   :  { %1964 = vmatmul.mubr.bf16.vlgmr.msra.gmra.mrb[4].mxu1 %v3240_v24  ;;  %2005 = vmatmul.mubr.bf16.vlgmr.msra.gmra.mrb[8].mxu0 %v3240_v24 }
 0x140   :  { %2014 = vmatpush1.bf16.msra.mxu1 %v2805_v26  ;;  %2055 = vmatpush1.bf16.msra.mxu0 %v2807_v27  ;;  %v184_v26 = vld [vmem:[#allocation4 + $0x138] sm:$0xff] }
 0x141   :  { %2015 = vmatprep.subr.bf16.mxu1 %v2838_v28  ;;  %2056 = vmatprep.subr.bf16.mxu0 %v2840_v29  ;;  %v200_v27 = vld [vmem:[#allocation4 + $0x1b8] sm:$0xff]  ;;  %v2809_v28 = vcombine.low %v151_v15, %v167_v16  ;;  %v2811_v29 = vcombine.low %v152_v17, %v168_v18  ;;  %v3034_v15 = vcombine.high %v375_v8, %v391_v9  ;;  %v153_v17 = vld [vmem:[#allocation4 + $0x40] sm:$0xff] }
 0x142   :  { %2045 = vmatprep.mubr.bf16.mxu1 %v3164_v14  ;;  %2086 = vmatprep.mubr.bf16.mxu0 %v3164_v14  ;;  %v2844_v31 = vcombine.high %v184_v26, %v200_v27  ;;  %v169_v18 = vld [vmem:[#allocation4 + $0xc0] sm:$0xff] }
 0x144   :  { %2016 = vmatpush1.bf16.msra.mxu1 %v2837_v34  ;;  %2057 = vmatpush1.bf16.msra.mxu0 %v2839_v35  ;;  %v216_v34 = vld [vmem:[#allocation4 + $0x238] sm:$0xff] }
 0x145   :  { %2017 = vmatprep.subr.bf16.mxu1 %v2870_v36  ;;  %2058 = vmatprep.subr.bf16.mxu0 %v2872_v37  ;;  %v232_v35 = vld [vmem:[#allocation4 + $0x2b8] sm:$0xff]  ;;  %v2841_v36 = vcombine.low %v183_v23, %v199_v25  ;;  %v2843_v37 = vcombine.low %v184_v26, %v200_v27  ;;  %v2814_v23 = vcombine.high %v153_v17, %v169_v18  ;;  %v185_v26 = vld [vmem:[#allocation4 + $0x140] sm:$0xff] }
 0x146   :  { %v2876_v39 = vcombine.high %v216_v34, %v232_v35  ;;  %v201_v27 = vld [vmem:[#allocation4 + $0x1c0] sm:$0xff] }
 0x148   :  { %2018 = vmatpush1.bf16.msra.mxu1 %v2869_v42  ;;  %2059 = vmatpush1.bf16.msra.mxu0 %v2871_v43  ;;  %v248_v42 = vld [vmem:[#allocation4 + $0x338] sm:$0xff] }
 0x149   :  { %2019 = vmatprep.subr.bf16.mxu1 %v2902_v44  ;;  %2060 = vmatprep.subr.bf16.mxu0 %v2904_v45  ;;  %v264_v43 = vld [vmem:[#allocation4 + $0x3b8] sm:$0xff]  ;;  %v2873_v44 = vcombine.low %v215_v32, %v231_v33  ;;  %v2875_v45 = vcombine.low %v216_v34, %v232_v35  ;;  %v2846_v32 = vcombine.high %v185_v26, %v201_v27  ;;  %v217_v34 = vld [vmem:[#allocation4 + $0x240] sm:$0xff] }
 0x14a   :  { %v2908_v47 = vcombine.high %v248_v42, %v264_v43  ;;  %v233_v35 = vld [vmem:[#allocation4 + $0x2c0] sm:$0xff] }
 0x14c   :  { %2020 = vmatpush1.bf16.msra.mxu1 %v2901_v50  ;;  %2061 = vmatpush1.bf16.msra.mxu0 %v2903_v51  ;;  %v280_v50 = vld [vmem:[#allocation4 + $0x438] sm:$0xff] }
 0x14d   :  { %2021 = vmatprep.subr.bf16.mxu1 %v2934_v52  ;;  %2062 = vmatprep.subr.bf16.mxu0 %v2936_v53  ;;  %v296_v51 = vld [vmem:[#allocation4 + $0x4b8] sm:$0xff]  ;;  %v2905_v52 = vcombine.low %v247_v40, %v263_v41  ;;  %v2907_v53 = vcombine.low %v248_v42, %v264_v43  ;;  %v2878_v40 = vcombine.high %v217_v34, %v233_v35  ;;  %v249_v42 = vld [vmem:[#allocation4 + $0x340] sm:$0xff] }
 0x14e   :  { %v2940_v55 = vcombine.high %v280_v50, %v296_v51  ;;  %v265_v43 = vld [vmem:[#allocation4 + $0x3c0] sm:$0xff] }
 0x150   :  { %2022 = vmatpush1.bf16.msra.mxu1 %v2933_v58  ;;  %2063 = vmatpush1.bf16.msra.mxu0 %v2935_v59  ;;  %v312_v58 = vld [vmem:[#allocation4 + $0x538] sm:$0xff] }
 0x151   :  { %2023 = vmatprep.subr.bf16.mxu1 %v2966_v60  ;;  %2064 = vmatprep.subr.bf16.mxu0 %v2968_v61  ;;  %v328_v59 = vld [vmem:[#allocation4 + $0x5b8] sm:$0xff]  ;;  %v2937_v60 = vcombine.low %v279_v48, %v295_v49  ;;  %v2939_v61 = vcombine.low %v280_v50, %v296_v51  ;;  %v2910_v48 = vcombine.high %v249_v42, %v265_v43  ;;  %v281_v50 = vld [vmem:[#allocation4 + $0x440] sm:$0xff] }
 0x152   :  { %v2972_v63 = vcombine.high %v312_v58, %v328_v59  ;;  %v297_v51 = vld [vmem:[#allocation4 + $0x4c0] sm:$0xff] }
 0x154   :  { %2024 = vmatpush1.bf16.msra.mxu1 %v2965_v2  ;;  %2065 = vmatpush1.bf16.msra.mxu0 %v2967_v3  ;;  %v344_v2 = vld [vmem:[#allocation4 + $0x638] sm:$0xff] }
 0x155   :  { %2025 = vmatprep.subr.bf16.mxu1 %v2998_v4  ;;  %2066 = vmatprep.subr.bf16.mxu0 %v3000_v5  ;;  %v360_v3 = vld [vmem:[#allocation4 + $0x6b8] sm:$0xff]  ;;  %v2969_v4 = vcombine.low %v311_v56, %v327_v57  ;;  %v2971_v5 = vcombine.low %v312_v58, %v328_v59  ;;  %v2942_v56 = vcombine.high %v281_v50, %v297_v51  ;;  %v313_v58 = vld [vmem:[#allocation4 + $0x540] sm:$0xff] }
 0x156   :  { %v3004_v7 = vcombine.high %v344_v2, %v360_v3  ;;  %v329_v59 = vld [vmem:[#allocation4 + $0x5c0] sm:$0xff] }
 0x158   :  { %2026 = vmatpush1.bf16.msra.mxu1 %v2997_v10  ;;  %2067 = vmatpush1.bf16.msra.mxu0 %v2999_v11  ;;  %v376_v10 = vld [vmem:[#allocation4 + $0x738] sm:$0xff] }
 0x159   :  { %2027 = vmatprep.subr.bf16.mxu1 %v3030_v12  ;;  %2068 = vmatprep.subr.bf16.mxu0 %v3032_v13  ;;  %v392_v11 = vld [vmem:[#allocation4 + $0x7b8] sm:$0xff]  ;;  %v3001_v12 = vcombine.low %v343_v0, %v359_v1  ;;  %v3003_v13 = vcombine.low %v344_v2, %v360_v3  ;;  %v2974_v0 = vcombine.high %v313_v58, %v329_v59  ;;  %v345_v2 = vld [vmem:[#allocation4 + $0x640] sm:$0xff] }
 0x15a   :  { %v3036_v16 = vcombine.high %v376_v10, %v392_v11  ;;  %v361_v3 = vld [vmem:[#allocation4 + $0x6c0] sm:$0xff] }
 0x15c   :  { %2028 = vmatpush1.bf16.msra.mxu1 %v3029_v19  ;;  %2069 = vmatpush1.bf16.msra.mxu0 %v3031_v20  ;;  %v154_v19 = vld [vmem:[#allocation4 + $0x48] sm:$0xff] }
 0x15d   :  { %2095 = vmatprep.subr.bf16.mxu1 %v2810_v21  ;;  %2136 = vmatprep.subr.bf16.mxu0 %v2812_v22  ;;  %v170_v20 = vld [vmem:[#allocation4 + $0xc8] sm:$0xff]  ;;  %v3033_v21 = vcombine.low %v375_v8, %v391_v9  ;;  %v3035_v22 = vcombine.low %v376_v10, %v392_v11  ;;  %v3006_v8 = vcombine.high %v345_v2, %v361_v3  ;;  %v377_v10 = vld [vmem:[#allocation4 + $0x740] sm:$0xff] }
 0x15e   :  { %v2816_v25 = vcombine.high %v154_v19, %v170_v20  ;;  %v393_v11 = vld [vmem:[#allocation4 + $0x7c0] sm:$0xff] }
 0x15f   :  { %2046 = vmatmul.mubr.bf16.vlgmr.msra.gmra.mrb[8].mxu1 %v3240_v24  ;;  %2087 = vmatmul.mubr.bf16.vlgmr.msra.gmra.mrb[12].mxu0 %v3240_v24 }
 0x160   :  { %2096 = vmatpush1.bf16.msra.mxu1 %v2809_v28  ;;  %2137 = vmatpush1.bf16.msra.mxu0 %v2811_v29  ;;  %v186_v28 = vld [vmem:[#allocation4 + $0x148] sm:$0xff] }
 0x161   :  { %2097 = vmatprep.subr.bf16.mxu1 %v2842_v30  ;;  %2138 = vmatprep.subr.bf16.mxu0 %v2844_v31  ;;  %v202_v29 = vld [vmem:[#allocation4 + $0x1c8] sm:$0xff]  ;;  %v2813_v30 = vcombine.low %v153_v17, %v169_v18  ;;  %v2815_v31 = vcombine.low %v154_v19, %v170_v20  ;;  %v3038_v17 = vcombine.high %v377_v10, %v393_v11  ;;  %v155_v19 = vld [vmem:[#allocation4 + $0x50] sm:$0xff] }
 0x162   :  { %2127 = vmatprep.mubr.bf16.mxu1 %v3164_v14  ;;  %2168 = vmatprep.mubr.bf16.mxu0 %v3164_v14  ;;  %v2848_v33 = vcombine.high %v186_v28, %v202_v29  ;;  %v171_v20 = vld [vmem:[#allocation4 + $0xd0] sm:$0xff] }
 0x164   :  { %2098 = vmatpush1.bf16.msra.mxu1 %v2841_v36  ;;  %2139 = vmatpush1.bf16.msra.mxu0 %v2843_v37  ;;  %v218_v36 = vld [vmem:[#allocation4 + $0x248] sm:$0xff] }
 0x165   :  { %2099 = vmatprep.subr.bf16.mxu1 %v2874_v38  ;;  %2140 = vmatprep.subr.bf16.mxu0 %v2876_v39  ;;  %v234_v37 = vld [vmem:[#allocation4 + $0x2c8] sm:$0xff]  ;;  %v2845_v38 = vcombine.low %v185_v26, %v201_v27  ;;  %v2847_v39 = vcombine.low %v186_v28, %v202_v29  ;;  %v2818_v26 = vcombine.high %v155_v19, %v171_v20  ;;  %v187_v28 = vld [vmem:[#allocation4 + $0x150] sm:$0xff] }
 0x166   :  { %v2880_v41 = vcombine.high %v218_v36, %v234_v37  ;;  %v203_v29 = vld [vmem:[#allocation4 + $0x1d0] sm:$0xff] }
 0x168   :  { %2100 = vmatpush1.bf16.msra.mxu1 %v2873_v44  ;;  %2141 = vmatpush1.bf16.msra.mxu0 %v2875_v45  ;;  %v250_v44 = vld [vmem:[#allocation4 + $0x348] sm:$0xff] }
 0x169   :  { %2101 = vmatprep.subr.bf16.mxu1 %v2906_v46  ;;  %2142 = vmatprep.subr.bf16.mxu0 %v2908_v47  ;;  %v266_v45 = vld [vmem:[#allocation4 + $0x3c8] sm:$0xff]  ;;  %v2877_v46 = vcombine.low %v217_v34, %v233_v35  ;;  %v2879_v47 = vcombine.low %v218_v36, %v234_v37  ;;  %v2850_v34 = vcombine.high %v187_v28, %v203_v29  ;;  %v219_v36 = vld [vmem:[#allocation4 + $0x250] sm:$0xff] }
 0x16a   :  { %v2912_v49 = vcombine.high %v250_v44, %v266_v45  ;;  %v235_v37 = vld [vmem:[#allocation4 + $0x2d0] sm:$0xff] }
 0x16c   :  { %2102 = vmatpush1.bf16.msra.mxu1 %v2905_v52  ;;  %2143 = vmatpush1.bf16.msra.mxu0 %v2907_v53  ;;  %v282_v52 = vld [vmem:[#allocation4 + $0x448] sm:$0xff] }
 0x16d   :  { %2103 = vmatprep.subr.bf16.mxu1 %v2938_v54  ;;  %2144 = vmatprep.subr.bf16.mxu0 %v2940_v55  ;;  %v298_v53 = vld [vmem:[#allocation4 + $0x4c8] sm:$0xff]  ;;  %v2909_v54 = vcombine.low %v249_v42, %v265_v43  ;;  %v2911_v55 = vcombine.low %v250_v44, %v266_v45  ;;  %v2882_v42 = vcombine.high %v219_v36, %v235_v37  ;;  %v251_v44 = vld [vmem:[#allocation4 + $0x350] sm:$0xff] }
 0x16e   :  { %v2944_v57 = vcombine.high %v282_v52, %v298_v53  ;;  %v267_v45 = vld [vmem:[#allocation4 + $0x3d0] sm:$0xff] }
 0x170   :  { %2104 = vmatpush1.bf16.msra.mxu1 %v2937_v60  ;;  %2145 = vmatpush1.bf16.msra.mxu0 %v2939_v61  ;;  %v314_v60 = vld [vmem:[#allocation4 + $0x548] sm:$0xff] }
 0x171   :  { %2105 = vmatprep.subr.bf16.mxu1 %v2970_v62  ;;  %2146 = vmatprep.subr.bf16.mxu0 %v2972_v63  ;;  %v330_v61 = vld [vmem:[#allocation4 + $0x5c8] sm:$0xff]  ;;  %v2941_v62 = vcombine.low %v281_v50, %v297_v51  ;;  %v2943_v63 = vcombine.low %v282_v52, %v298_v53  ;;  %v2914_v50 = vcombine.high %v251_v44, %v267_v45  ;;  %v283_v52 = vld [vmem:[#allocation4 + $0x450] sm:$0xff] }
 0x172   :  { %v2976_v1 = vcombine.high %v314_v60, %v330_v61  ;;  %v299_v53 = vld [vmem:[#allocation4 + $0x4d0] sm:$0xff] }
 0x174   :  { %2106 = vmatpush1.bf16.msra.mxu1 %v2969_v4  ;;  %2147 = vmatpush1.bf16.msra.mxu0 %v2971_v5  ;;  %v346_v4 = vld [vmem:[#allocation4 + $0x648] sm:$0xff] }
 0x175   :  { %2107 = vmatprep.subr.bf16.mxu1 %v3002_v6  ;;  %2148 = vmatprep.subr.bf16.mxu0 %v3004_v7  ;;  %v362_v5 = vld [vmem:[#allocation4 + $0x6c8] sm:$0xff]  ;;  %v2973_v6 = vcombine.low %v313_v58, %v329_v59  ;;  %v2975_v7 = vcombine.low %v314_v60, %v330_v61  ;;  %v2946_v58 = vcombine.high %v283_v52, %v299_v53  ;;  %v315_v60 = vld [vmem:[#allocation4 + $0x550] sm:$0xff] }
 0x176   :  { %v3008_v9 = vcombine.high %v346_v4, %v362_v5  ;;  %v331_v61 = vld [vmem:[#allocation4 + $0x5d0] sm:$0xff] }
 0x178   :  { %2108 = vmatpush1.bf16.msra.mxu1 %v3001_v12  ;;  %2149 = vmatpush1.bf16.msra.mxu0 %v3003_v13  ;;  %v378_v12 = vld [vmem:[#allocation4 + $0x748] sm:$0xff] }
 0x179   :  { %2109 = vmatprep.subr.bf16.mxu1 %v3034_v15  ;;  %2150 = vmatprep.subr.bf16.mxu0 %v3036_v16  ;;  %v394_v13 = vld [vmem:[#allocation4 + $0x7c8] sm:$0xff]  ;;  %v3005_v15 = vcombine.low %v345_v2, %v361_v3  ;;  %v3007_v16 = vcombine.low %v346_v4, %v362_v5  ;;  %v2978_v2 = vcombine.high %v315_v60, %v331_v61  ;;  %v347_v4 = vld [vmem:[#allocation4 + $0x650] sm:$0xff] }
 0x17a   :  { %v3040_v18 = vcombine.high %v378_v12, %v394_v13  ;;  %v363_v5 = vld [vmem:[#allocation4 + $0x6d0] sm:$0xff] }
 0x17c   :  { %2110 = vmatpush1.bf16.msra.mxu1 %v3033_v21  ;;  %2151 = vmatpush1.bf16.msra.mxu0 %v3035_v22  ;;  %v156_v21 = vld [vmem:[#allocation4 + $0x58] sm:$0xff] }
 0x17d   :  { %2177 = vmatprep.subr.bf16.mxu1 %v2814_v23  ;;  %2218 = vmatprep.subr.bf16.mxu0 %v2816_v25  ;;  %v172_v22 = vld [vmem:[#allocation4 + $0xd8] sm:$0xff]  ;;  %v3037_v23 = vcombine.low %v377_v10, %v393_v11  ;;  %v3039_v25 = vcombine.low %v378_v12, %v394_v13  ;;  %v3010_v10 = vcombine.high %v347_v4, %v363_v5  ;;  %v379_v12 = vld [vmem:[#allocation4 + $0x750] sm:$0xff] }
 0x17e   :  { %v2820_v27 = vcombine.high %v156_v21, %v172_v22  ;;  %v395_v13 = vld [vmem:[#allocation4 + $0x7d0] sm:$0xff] }
 0x17f   :  { %2128 = vmatmul.mubr.bf16.vlgmr.msra.gmra.mrb[12].mxu1 %v3240_v24  ;;  %2169 = vmatmul.mubr.bf16.vlgmr.msra.gmra.mrb[16].mxu0 %v3240_v24 }
 0x180   :  { %2178 = vmatpush1.bf16.msra.mxu1 %v2813_v30  ;;  %2219 = vmatpush1.bf16.msra.mxu0 %v2815_v31  ;;  %v188_v30 = vld [vmem:[#allocation4 + $0x158] sm:$0xff] }
 0x181   :  { %2179 = vmatprep.subr.bf16.mxu1 %v2846_v32  ;;  %2220 = vmatprep.subr.bf16.mxu0 %v2848_v33  ;;  %v204_v31 = vld [vmem:[#allocation4 + $0x1d8] sm:$0xff]  ;;  %v2817_v32 = vcombine.low %v155_v19, %v171_v20  ;;  %v2819_v33 = vcombine.low %v156_v21, %v172_v22  ;;  %v3042_v19 = vcombine.high %v379_v12, %v395_v13  ;;  %v157_v21 = vld [vmem:[#allocation4 + $0x60] sm:$0xff] }
 0x182   :  { %2209 = vmatprep.mubr.bf16.mxu1 %v3164_v14  ;;  %2250 = vmatprep.mubr.bf16.mxu0 %v3164_v14  ;;  %v2852_v35 = vcombine.high %v188_v30, %v204_v31  ;;  %v173_v22 = vld [vmem:[#allocation4 + $0xe0] sm:$0xff] }
 0x184   :  { %2180 = vmatpush1.bf16.msra.mxu1 %v2845_v38  ;;  %2221 = vmatpush1.bf16.msra.mxu0 %v2847_v39  ;;  %v220_v38 = vld [vmem:[#allocation4 + $0x258] sm:$0xff] }
 0x185   :  { %2181 = vmatprep.subr.bf16.mxu1 %v2878_v40  ;;  %2222 = vmatprep.subr.bf16.mxu0 %v2880_v41  ;;  %v236_v39 = vld [vmem:[#allocation4 + $0x2d8] sm:$0xff]  ;;  %v2849_v40 = vcombine.low %v187_v28, %v203_v29  ;;  %v2851_v41 = vcombine.low %v188_v30, %v204_v31  ;;  %v2822_v28 = vcombine.high %v157_v21, %v173_v22  ;;  %v189_v30 = vld [vmem:[#allocation4 + $0x160] sm:$0xff] }
 0x186   :  { %v2884_v43 = vcombine.high %v220_v38, %v236_v39  ;;  %v205_v31 = vld [vmem:[#allocation4 + $0x1e0] sm:$0xff] }
 0x188   :  { %2182 = vmatpush1.bf16.msra.mxu1 %v2877_v46  ;;  %2223 = vmatpush1.bf16.msra.mxu0 %v2879_v47  ;;  %v252_v46 = vld [vmem:[#allocation4 + $0x358] sm:$0xff] }
 0x189   :  { %2183 = vmatprep.subr.bf16.mxu1 %v2910_v48  ;;  %2224 = vmatprep.subr.bf16.mxu0 %v2912_v49  ;;  %v268_v47 = vld [vmem:[#allocation4 + $0x3d8] sm:$0xff]  ;;  %v2881_v48 = vcombine.low %v219_v36, %v235_v37  ;;  %v2883_v49 = vcombine.low %v220_v38, %v236_v39  ;;  %v2854_v36 = vcombine.high %v189_v30, %v205_v31  ;;  %v221_v38 = vld [vmem:[#allocation4 + $0x260] sm:$0xff] }
 0x18a   :  { %v2916_v51 = vcombine.high %v252_v46, %v268_v47  ;;  %v237_v39 = vld [vmem:[#allocation4 + $0x2e0] sm:$0xff] }
 0x18c   :  { %2184 = vmatpush1.bf16.msra.mxu1 %v2909_v54  ;;  %2225 = vmatpush1.bf16.msra.mxu0 %v2911_v55  ;;  %v284_v54 = vld [vmem:[#allocation4 + $0x458] sm:$0xff] }
 0x18d   :  { %2185 = vmatprep.subr.bf16.mxu1 %v2942_v56  ;;  %2226 = vmatprep.subr.bf16.mxu0 %v2944_v57  ;;  %v300_v55 = vld [vmem:[#allocation4 + $0x4d8] sm:$0xff]  ;;  %v2913_v56 = vcombine.low %v251_v44, %v267_v45  ;;  %v2915_v57 = vcombine.low %v252_v46, %v268_v47  ;;  %v2886_v44 = vcombine.high %v221_v38, %v237_v39  ;;  %v253_v46 = vld [vmem:[#allocation4 + $0x360] sm:$0xff] }
 0x18e   :  { %v2948_v59 = vcombine.high %v284_v54, %v300_v55  ;;  %v269_v47 = vld [vmem:[#allocation4 + $0x3e0] sm:$0xff] }
 0x190   :  { %2186 = vmatpush1.bf16.msra.mxu1 %v2941_v62  ;;  %2227 = vmatpush1.bf16.msra.mxu0 %v2943_v63  ;;  %v316_v62 = vld [vmem:[#allocation4 + $0x558] sm:$0xff] }
 0x191   :  { %2187 = vmatprep.subr.bf16.mxu1 %v2974_v0  ;;  %2228 = vmatprep.subr.bf16.mxu0 %v2976_v1  ;;  %v332_v63 = vld [vmem:[#allocation4 + $0x5d8] sm:$0xff]  ;;  %v2945_v0 = vcombine.low %v283_v52, %v299_v53  ;;  %v2947_v1 = vcombine.low %v284_v54, %v300_v55  ;;  %v2918_v52 = vcombine.high %v253_v46, %v269_v47  ;;  %v285_v54 = vld [vmem:[#allocation4 + $0x460] sm:$0xff] }
 0x192   :  { %v2980_v3 = vcombine.high %v316_v62, %v332_v63  ;;  %v301_v55 = vld [vmem:[#allocation4 + $0x4e0] sm:$0xff] }
 0x194   :  { %2188 = vmatpush1.bf16.msra.mxu1 %v2973_v6  ;;  %2229 = vmatpush1.bf16.msra.mxu0 %v2975_v7  ;;  %v348_v6 = vld [vmem:[#allocation4 + $0x658] sm:$0xff] }
 0x195   :  { %2189 = vmatprep.subr.bf16.mxu1 %v3006_v8  ;;  %2230 = vmatprep.subr.bf16.mxu0 %v3008_v9  ;;  %v364_v7 = vld [vmem:[#allocation4 + $0x6d8] sm:$0xff]  ;;  %v2977_v8 = vcombine.low %v315_v60, %v331_v61  ;;  %v2979_v9 = vcombine.low %v316_v62, %v332_v63  ;;  %v2950_v60 = vcombine.high %v285_v54, %v301_v55  ;;  %v317_v62 = vld [vmem:[#allocation4 + $0x560] sm:$0xff] }
 0x196   :  { %v3012_v11 = vcombine.high %v348_v6, %v364_v7  ;;  %v333_v63 = vld [vmem:[#allocation4 + $0x5e0] sm:$0xff] }
 0x198   :  { %2190 = vmatpush1.bf16.msra.mxu1 %v3005_v15  ;;  %2231 = vmatpush1.bf16.msra.mxu0 %v3007_v16  ;;  %v380_v15 = vld [vmem:[#allocation4 + $0x758] sm:$0xff] }
 0x199   :  { %2191 = vmatprep.subr.bf16.mxu1 %v3038_v17  ;;  %2232 = vmatprep.subr.bf16.mxu0 %v3040_v18  ;;  %v396_v16 = vld [vmem:[#allocation4 + $0x7d8] sm:$0xff]  ;;  %v3009_v17 = vcombine.low %v347_v4, %v363_v5  ;;  %v3011_v18 = vcombine.low %v348_v6, %v364_v7  ;;  %v2982_v4 = vcombine.high %v317_v62, %v333_v63  ;;  %v349_v6 = vld [vmem:[#allocation4 + $0x660] sm:$0xff] }
 0x19a   :  { %v3044_v20 = vcombine.high %v380_v15, %v396_v16  ;;  %v365_v7 = vld [vmem:[#allocation4 + $0x6e0] sm:$0xff] }
 0x19c   :  { %2192 = vmatpush1.bf16.msra.mxu1 %v3037_v23  ;;  %2233 = vmatpush1.bf16.msra.mxu0 %v3039_v25  ;;  %v158_v23 = vld [vmem:[#allocation4 + $0x68] sm:$0xff] }
 0x19d   :  { %2259 = vmatprep.subr.bf16.mxu1 %v2818_v26  ;;  %2300 = vmatprep.subr.bf16.mxu0 %v2820_v27  ;;  %v174_v25 = vld [vmem:[#allocation4 + $0xe8] sm:$0xff]  ;;  %v3041_v26 = vcombine.low %v379_v12, %v395_v13  ;;  %v3043_v27 = vcombine.low %v380_v15, %v396_v16  ;;  %v3014_v12 = vcombine.high %v349_v6, %v365_v7  ;;  %v381_v15 = vld [vmem:[#allocation4 + $0x760] sm:$0xff] }
 0x19e   :  { %v2824_v29 = vcombine.high %v158_v23, %v174_v25  ;;  %v397_v16 = vld [vmem:[#allocation4 + $0x7e0] sm:$0xff] }
 0x19f   :  { %2210 = vmatmul.mubr.bf16.vlgmr.msra.gmra.mrb[16].mxu1 %v3240_v24  ;;  %2251 = vmatmul.mubr.bf16.vlgmr.msra.gmra.mrb[20].mxu0 %v3240_v24 }
 0x1a0   :  { %2260 = vmatpush1.bf16.msra.mxu1 %v2817_v32  ;;  %2301 = vmatpush1.bf16.msra.mxu0 %v2819_v33  ;;  %v190_v32 = vld [vmem:[#allocation4 + $0x168] sm:$0xff] }
 0x1a1   :  { %2261 = vmatprep.subr.bf16.mxu1 %v2850_v34  ;;  %2302 = vmatprep.subr.bf16.mxu0 %v2852_v35  ;;  %v206_v33 = vld [vmem:[#allocation4 + $0x1e8] sm:$0xff]  ;;  %v2821_v34 = vcombine.low %v157_v21, %v173_v22  ;;  %v2823_v35 = vcombine.low %v158_v23, %v174_v25  ;;  %v3046_v21 = vcombine.high %v381_v15, %v397_v16  ;;  %v159_v23 = vld [vmem:[#allocation4 + $0x70] sm:$0xff] }
 0x1a2   :  { %2291 = vmatprep.mubr.bf16.mxu1 %v3164_v14  ;;  %2332 = vmatprep.mubr.bf16.mxu0 %v3164_v14  ;;  %v2856_v37 = vcombine.high %v190_v32, %v206_v33  ;;  %v175_v25 = vld [vmem:[#allocation4 + $0xf0] sm:$0xff] }
 0x1a4   :  { %2262 = vmatpush1.bf16.msra.mxu1 %v2849_v40  ;;  %2303 = vmatpush1.bf16.msra.mxu0 %v2851_v41  ;;  %v222_v40 = vld [vmem:[#allocation4 + $0x268] sm:$0xff] }
 0x1a5   :  { %2263 = vmatprep.subr.bf16.mxu1 %v2882_v42  ;;  %2304 = vmatprep.subr.bf16.mxu0 %v2884_v43  ;;  %v238_v41 = vld [vmem:[#allocation4 + $0x2e8] sm:$0xff]  ;;  %v2853_v42 = vcombine.low %v189_v30, %v205_v31  ;;  %v2855_v43 = vcombine.low %v190_v32, %v206_v33  ;;  %v2826_v30 = vcombine.high %v159_v23, %v175_v25  ;;  %v191_v32 = vld [vmem:[#allocation4 + $0x170] sm:$0xff] }
 0x1a6   :  { %v2888_v45 = vcombine.high %v222_v40, %v238_v41  ;;  %v207_v33 = vld [vmem:[#allocation4 + $0x1f0] sm:$0xff] }
 0x1a8   :  { %2264 = vmatpush1.bf16.msra.mxu1 %v2881_v48  ;;  %2305 = vmatpush1.bf16.msra.mxu0 %v2883_v49  ;;  %v254_v48 = vld [vmem:[#allocation4 + $0x368] sm:$0xff] }
 0x1a9   :  { %2265 = vmatprep.subr.bf16.mxu1 %v2914_v50  ;;  %2306 = vmatprep.subr.bf16.mxu0 %v2916_v51  ;;  %v270_v49 = vld [vmem:[#allocation4 + $0x3e8] sm:$0xff]  ;;  %v2885_v50 = vcombine.low %v221_v38, %v237_v39  ;;  %v2887_v51 = vcombine.low %v222_v40, %v238_v41  ;;  %v2858_v38 = vcombine.high %v191_v32, %v207_v33  ;;  %v223_v40 = vld [vmem:[#allocation4 + $0x270] sm:$0xff] }
 0x1aa   :  { %v2920_v53 = vcombine.high %v254_v48, %v270_v49  ;;  %v239_v41 = vld [vmem:[#allocation4 + $0x2f0] sm:$0xff] }
 0x1ac   :  { %2266 = vmatpush1.bf16.msra.mxu1 %v2913_v56  ;;  %2307 = vmatpush1.bf16.msra.mxu0 %v2915_v57  ;;  %v286_v56 = vld [vmem:[#allocation4 + $0x468] sm:$0xff] }
 0x1ad   :  { %2267 = vmatprep.subr.bf16.mxu1 %v2946_v58  ;;  %2308 = vmatprep.subr.bf16.mxu0 %v2948_v59  ;;  %v302_v57 = vld [vmem:[#allocation4 + $0x4e8] sm:$0xff]  ;;  %v2917_v58 = vcombine.low %v253_v46, %v269_v47  ;;  %v2919_v59 = vcombine.low %v254_v48, %v270_v49  ;;  %v2890_v46 = vcombine.high %v223_v40, %v239_v41  ;;  %v255_v48 = vld [vmem:[#allocation4 + $0x370] sm:$0xff] }
 0x1ae   :  { %v2952_v61 = vcombine.high %v286_v56, %v302_v57  ;;  %v271_v49 = vld [vmem:[#allocation4 + $0x3f0] sm:$0xff] }
 0x1b0   :  { %2268 = vmatpush1.bf16.msra.mxu1 %v2945_v0  ;;  %2309 = vmatpush1.bf16.msra.mxu0 %v2947_v1  ;;  %v318_v0 = vld [vmem:[#allocation4 + $0x568] sm:$0xff] }
 0x1b1   :  { %2269 = vmatprep.subr.bf16.mxu1 %v2978_v2  ;;  %2310 = vmatprep.subr.bf16.mxu0 %v2980_v3  ;;  %v334_v1 = vld [vmem:[#allocation4 + $0x5e8] sm:$0xff]  ;;  %v2949_v2 = vcombine.low %v285_v54, %v301_v55  ;;  %v2951_v3 = vcombine.low %v286_v56, %v302_v57  ;;  %v2922_v55 = vcombine.high %v255_v48, %v271_v49  ;;  %v287_v57 = vld [vmem:[#allocation4 + $0x470] sm:$0xff] }
 0x1b2   :  { %v2984_v5 = vcombine.high %v318_v0, %v334_v1 }
 0x1b4   :  { %2270 = vmatpush1.bf16.msra.mxu1 %v2977_v8  ;;  %2311 = vmatpush1.bf16.msra.mxu0 %v2979_v9  ;;  %v350_v8 = vld [vmem:[#allocation4 + $0x668] sm:$0xff] }
 0x1b5   :  { %2271 = vmatprep.subr.bf16.mxu1 %v3010_v10  ;;  %2312 = vmatprep.subr.bf16.mxu0 %v3012_v11  ;;  %v366_v9 = vld [vmem:[#allocation4 + $0x6e8] sm:$0xff]  ;;  %v2981_v10 = vcombine.low %v317_v62, %v333_v63  ;;  %v2983_v11 = vcombine.low %v318_v0, %v334_v1  ;;  %v2921_v62 = vcombine.low %v255_v48, %v271_v49  ;;  %v319_v1 = vld [vmem:[#allocation4 + $0x570] sm:$0xff] }
 0x1b6   :  { %v3016_v13 = vcombine.high %v350_v8, %v366_v9 }
 0x1b8   :  { %2272 = vmatpush1.bf16.msra.mxu1 %v3009_v17  ;;  %2313 = vmatpush1.bf16.msra.mxu0 %v3011_v18  ;;  %v382_v17 = vld [vmem:[#allocation4 + $0x768] sm:$0xff] }
 0x1b9   :  { %2273 = vmatprep.subr.bf16.mxu1 %v3042_v19  ;;  %2314 = vmatprep.subr.bf16.mxu0 %v3044_v20  ;;  %v398_v18 = vld [vmem:[#allocation4 + $0x7e8] sm:$0xff]  ;;  %v3013_v19 = vcombine.low %v349_v6, %v365_v7  ;;  %v3015_v20 = vcombine.low %v350_v8, %v366_v9  ;;  %v3278_v9 = vld [vmem:[#allocation6] sm:$0xff] }
 0x1ba   :  { %v3048_v22 = vcombine.high %v382_v17, %v398_v18 }
 0x1bc   :  { %2274 = vmatpush1.bf16.msra.mxu1 %v3041_v26  ;;  %2315 = vmatpush1.bf16.msra.mxu0 %v3043_v27  ;;  %v160_v26 = vld [vmem:[#allocation4 + $0x78] sm:$0xff] }
 0x1bd   :  { %2341 = vmatprep.subr.bf16.mxu1 %v2822_v28  ;;  %2382 = vmatprep.subr.bf16.mxu0 %v2824_v29  ;;  %v176_v27 = vld [vmem:[#allocation4 + $0xf8] sm:$0xff]  ;;  %v3045_v28 = vcombine.low %v381_v15, %v397_v16  ;;  %v3047_v29 = vcombine.low %v382_v17, %v398_v18  ;;  %v351_v15 = vld [vmem:[#allocation4 + $0x670] sm:$0xff] }
 0x1be   :  { %v2828_v31 = vcombine.high %v160_v26, %v176_v27  ;;  %v367_v16 = vld [vmem:[#allocation4 + $0x6f0] sm:$0xff]  ;;  %v352_v17 = vld [vmem:[#allocation4 + $0x678] sm:$0xff] }
 0x1bf   :  { %2292 = vmatmul.mubr.bf16.vlgmr.msra.gmra.mrb[20].mxu1 %v3240_v24  ;;  %2333 = vmatmul.mubr.bf16.vlgmr.msra.gmra.mrb[24].mxu0 %v3240_v24  ;;  %v368_v18 = vld [vmem:[#allocation4 + $0x6f8] sm:$0xff] }
 0x1c0   :  { %2342 = vmatpush1.bf16.msra.mxu1 %v2821_v34  ;;  %2383 = vmatpush1.bf16.msra.mxu0 %v2823_v35  ;;  %v192_v34 = vld [vmem:[#allocation4 + $0x178] sm:$0xff] }
 0x1c1   :  { %2343 = vmatprep.subr.bf16.mxu1 %v2854_v36  ;;  %2384 = vmatprep.subr.bf16.mxu0 %v2856_v37  ;;  %v208_v35 = vld [vmem:[#allocation4 + $0x1f8] sm:$0xff]  ;;  %v2825_v36 = vcombine.low %v159_v23, %v175_v25  ;;  %v2827_v37 = vcombine.low %v160_v26, %v176_v27 }
 0x1c2   :  { %2373 = vmatprep.mubr.bf16.mxu1 %v3164_v14  ;;  %2414 = vmatprep.mubr.bf16.mxu0 %v3164_v14  ;;  %v2860_v39 = vcombine.high %v192_v34, %v208_v35 }
 0x1c4   :  { %2344 = vmatpush1.bf16.msra.mxu1 %v2853_v42  ;;  %2385 = vmatpush1.bf16.msra.mxu0 %v2855_v43  ;;  %v224_v42 = vld [vmem:[#allocation4 + $0x278] sm:$0xff] }
 0x1c5   :  { %2345 = vmatprep.subr.bf16.mxu1 %v2886_v44  ;;  %2386 = vmatprep.subr.bf16.mxu0 %v2888_v45  ;;  %v240_v43 = vld [vmem:[#allocation4 + $0x2f8] sm:$0xff]  ;;  %v2857_v44 = vcombine.low %v191_v32, %v207_v33  ;;  %v2859_v45 = vcombine.low %v192_v34, %v208_v35 }
 0x1c6   :  { %v2892_v47 = vcombine.high %v224_v42, %v240_v43  ;;  %v2891_v54 = vcombine.low %v224_v42, %v240_v43  ;;  %v384_v32 = vld [vmem:[#allocation4 + $0x778] sm:$0xff] }
 0x1c7   :  { %v400_v33 = vld [vmem:[#allocation4 + $0x7f8] sm:$0xff] }
 0x1c8   :  { %2346 = vmatpush1.bf16.msra.mxu1 %v2885_v50  ;;  %2387 = vmatpush1.bf16.msra.mxu0 %v2887_v51  ;;  %v256_v50 = vld [vmem:[#allocation4 + $0x378] sm:$0xff]  ;;  %v3052_v48 = vcombine.high %v384_v32, %v400_v33 }
 0x1c9   :  { %2347 = vmatprep.subr.bf16.mxu1 %v2918_v52  ;;  %2388 = vmatprep.subr.bf16.mxu0 %v2920_v53  ;;  %v272_v51 = vld [vmem:[#allocation4 + $0x3f8] sm:$0xff]  ;;  %v409_v52 = vlaneseq  ;;  %v2889_v53 = vcombine.low %v223_v40, %v239_v41 }
 0x1ca   :  { %v2924_v56 = vcombine.high %v256_v50, %v272_v51  ;;  %v2923_v63 = vcombine.low %v256_v50, %v272_v51 }
 0x1cc   :  { %2348 = vmatpush1.bf16.msra.mxu1 %v2917_v58  ;;  %2389 = vmatpush1.bf16.msra.mxu0 %v2919_v59  ;;  %v303_v58 = vld [vmem:[#allocation4 + $0x4f0] sm:$0xff]  ;;  %v288_v59 = vld [vmem:[#allocation4 + $0x478] sm:$0xff] }
 0x1cd   :  { %2349 = vmatprep.subr.bf16.mxu1 %v2950_v60  ;;  %2390 = vmatprep.subr.bf16.mxu0 %v2952_v61  ;;  %v304_v60 = vld [vmem:[#allocation4 + $0x4f8] sm:$0xff]  ;;  %v3270_v61 = vshrl.u32 %v409_v52, 7 }
 0x1ce   :  { %v2956_v0 = vcombine.high %v288_v59, %v304_v60  ;;  %v2955_v8 = vcombine.low %v288_v59, %v304_v60 }
 0x1cf   :  { %v3273_v6 = vsub.s32 0, %v3270_v61  ;;  %v3276_v7 = vsub.s32 2, %v3270_v61 }
 0x1d0   :  { %2350 = vmatpush1.bf16.msra.mxu1 %v2949_v2  ;;  %2391 = vmatpush1.bf16.msra.mxu0 %v2951_v3  ;;  %v335_v2 = vld [vmem:[#allocation4 + $0x5f0] sm:$0xff]  ;;  %v320_v3 = vld [vmem:[#allocation4 + $0x578] sm:$0xff] }
 0x1d1   :  { %2351 = vmatprep.subr.bf16.mxu1 %v2982_v4  ;;  %2392 = vmatprep.subr.bf16.mxu0 %v2984_v5  ;;  %v336_v4 = vld [vmem:[#allocation4 + $0x5f8] sm:$0xff]  ;;  %v2953_v5 = vcombine.low %v287_v57, %v303_v58 }
 0x1d2   :  { %v2987_v25 = vcombine.low %v320_v3, %v336_v4 }
 0x1d4   :  { %2352 = vmatpush1.bf16.msra.mxu1 %v2981_v10  ;;  %2393 = vmatpush1.bf16.msra.mxu0 %v2983_v11  ;;  %v3281_v10 = vsub.s32 1, %v3270_v61  ;;  %v3284_v11 = vsub.s32 3, %v3270_v61 }
 0x1d5   :  { %2353 = vmatprep.subr.bf16.mxu1 %v3014_v12  ;;  %2394 = vmatprep.subr.bf16.mxu0 %v3016_v13  ;;  %v2986_v12 = vcombine.high %v319_v1, %v335_v2  ;;  %v2988_v13 = vcombine.high %v320_v3, %v336_v4  ;;  %v3305_v3 = vsub.s32 4, %v3270_v61  ;;  %v3308_v4 = vsub.s32 6, %v3270_v61 }
 0x1d6   :  { %v416_v26 = vrot.slane %v3278_v9, %v3281_v10  ;;  %v424_v27 = vrot.slane %v3278_v9, %v3284_v11 }
 0x1d8   :  { %2354 = vmatpush1.bf16.msra.mxu1 %v3013_v19  ;;  %2395 = vmatpush1.bf16.msra.mxu0 %v3015_v20  ;;  %v412_v19 = vrot.slane %v3278_v9, %v3273_v6  ;;  %v420_v20 = vrot.slane %v3278_v9, %v3276_v7 }
 0x1d9   :  { %2355 = vmatprep.subr.bf16.mxu1 %v3046_v21  ;;  %2396 = vmatprep.subr.bf16.mxu0 %v3048_v22  ;;  %v2985_v21 = vcombine.low %v319_v1, %v335_v2  ;;  %v3165_v22 = vmov 1983009808  }
 0x1da   :  { %v2636_v23 = vunpack.c.l.s4 %v3165_v22 }
 0x1dc   :  { %2356 = vmatpush1.bf16.msra.mxu1 %v3045_v28  ;;  %2397 = vmatpush1.bf16.msra.mxu0 %v3047_v29  ;;  %v383_v28 = vld [vmem:[#allocation4 + $0x770] sm:$0xff]  ;;  %v2637_v41 = vunpack.c.0.s8 %v2636_v23 }
 0x1dd   :  { %2423 = vmatprep.subr.bf16.mxu1 %v2826_v30  ;;  %2464 = vmatprep.subr.bf16.mxu0 %v2828_v31  ;;  %v399_v29 = vld [vmem:[#allocation4 + $0x7f0] sm:$0xff]  ;;  %v3018_v30 = vcombine.high %v351_v15, %v367_v16  ;;  %v3020_v31 = vcombine.high %v352_v17, %v368_v18 }
 0x1de   :  { %v3050_v43 = vcombine.high %v383_v28, %v399_v29 }
 0x1df   :  { %2374 = vmatmul.mubr.bf16.vlgmr.msra.gmra.mrb[24].mxu1 %v3240_v24  ;;  %2415 = vmatmul.mubr.bf16.vlgmr.msra.gmra.mrb[28].mxu0 %v3240_v24 }
 0x1e0   :  { %2424 = vmatpush1.bf16.msra.mxu1 %v2825_v36  ;;  %2465 = vmatpush1.bf16.msra.mxu0 %v2827_v37  ;;  %v3017_v36 = vcombine.low %v351_v15, %v367_v16  ;;  %v3019_v37 = vcombine.low %v352_v17, %v368_v18 }
 0x1e1   :  { %2425 = vmatprep.subr.bf16.mxu1 %v2858_v38  ;;  %2466 = vmatprep.subr.bf16.mxu0 %v2860_v39 }
 0x1e2   :  { %2455 = vmatprep.mubr.bf16.mxu1 %v3164_v14  ;;  %2496 = vmatprep.mubr.bf16.mxu0 %v3164_v14  ;;  %v2954_v14 = vcombine.high %v287_v57, %v303_v58  ;;  %v3049_v58 = vcombine.low %v383_v28, %v399_v29 }
 0x1e4   :  { %2426 = vmatpush1.bf16.msra.mxu1 %v2857_v44  ;;  %2467 = vmatpush1.bf16.msra.mxu0 %v2859_v45 }
 0x1e5   :  { %2427 = vmatprep.subr.bf16.mxu1 %v2890_v46  ;;  %2468 = vmatprep.subr.bf16.mxu0 %v2892_v47 }
 0x1e8   :  { %2428 = vmatpush1.bf16.msra.mxu1 %v2889_v53  ;;  %2469 = vmatpush1.bf16.msra.mxu0 %v2891_v54 }
 0x1e9   :  { %2429 = vmatprep.subr.bf16.mxu1 %v2922_v55  ;;  %2470 = vmatprep.subr.bf16.mxu0 %v2924_v56  ;;  %v3295_v55 = vsub.s32 %v2637_v41, %v3270_v61 }
 0x1ec   :  { %2430 = vmatpush1.bf16.msra.mxu1 %v2921_v62  ;;  %2471 = vmatpush1.bf16.msra.mxu0 %v2923_v63  ;;  %v3051_v62 = vcombine.low %v384_v32, %v400_v33 }
 0x1ed   :  { %2431 = vmatprep.subr.bf16.mxu1 %v2954_v14  ;;  %2472 = vmatprep.subr.bf16.mxu0 %v2956_v0 }
 0x1f0   :  { %2432 = vmatpush1.bf16.msra.mxu1 %v2953_v5  ;;  %2473 = vmatpush1.bf16.msra.mxu0 %v2955_v8  ;;  %v3311_v5 = vsub.s32 5, %v3270_v61  ;;  %v3314_v8 = vsub.s32 7, %v3270_v61 }
 0x1f1   :  { %2433 = vmatprep.subr.bf16.mxu1 %v2986_v12  ;;  %2474 = vmatprep.subr.bf16.mxu0 %v2988_v13  ;;  %v428_v12 = vrot.slane %v3278_v9, %v3305_v3  ;;  %v436_v13 = vrot.slane %v3278_v9, %v3308_v4 }
 0x1f2   :  { %v1883_v34 = vpop.f32.mrb[0].mxu1  ;;  %v1924_v35 = vpop.f32.mrb[4].mxu0  ;;  %v440_v15 = vrot.slane %v3278_v9, %v3314_v8 }
 0x1f3   :  { %v1884_v38 = vadd.f32 %v1883_v34, %v412_v19  ;;  %v1925_v39 = vadd.f32 %v1924_v35, %v420_v20  ;;  %v1885_v40 = vpop.f32.mrb[1].mxu1  ;;  %v1926_v42 = vpop.f32.mrb[5].mxu0 }
 0x1f4   :  { %v1886_v44 = vadd.f32 %v1885_v40, %v416_v26  ;;  %v1927_v45 = vadd.f32 %v1926_v42, %v424_v27  ;;  %2434 = vmatpush1.bf16.msra.mxu1 %v2985_v21  ;;  %2475 = vmatpush1.bf16.msra.mxu0 %v2987_v25  ;;  %v1887_v46 = vpop.f32.mrb[2].mxu1  ;;  %v1928_v47 = vpop.f32.mrb[6].mxu0  ;;  %v402_v40 = vld [vmem:[#allocation6 + $0x8] sm:$0xff] }
 0x1f5   :  { %vm2505_vm2 = vcmp.gt.f32.partialorder %v1884_v38, 0.0  ;;  %v2537_v49 = vmul.f32 0.1, %v1884_v38  ;;  %vm2507_vm3 = vcmp.gt.f32.partialorder %v1925_v39, 0.0  ;;  %v2539_v50 = vmul.f32 0.1, %v1925_v39  ;;  %2435 = vmatprep.subr.bf16.mxu1 %v3018_v30  ;;  %2476 = vmatprep.subr.bf16.mxu0 %v3020_v31 }
 0x1f6   :  { %vm2506_vm4 = vcmp.gt.f32.partialorder %v1886_v44, 0.0  ;;  %v2538_v51 = vmul.f32 0.1, %v1886_v44  ;;  %vm2508_vm5 = vcmp.gt.f32.partialorder %v1927_v45, 0.0  ;;  %v2540_v52 = vmul.f32 0.1, %v1927_v45 }
 0x1f7   :  { %v2569_v53 = vsel %vm2505_vm2, %v1884_v38, %v2537_v49  ;;  %v2571_v54 = vsel %vm2507_vm3, %v1925_v39, %v2539_v50  ;;  %v1888_v56 = vpop.f32.mrb[3].mxu1  ;;  %v1929_v57 = vpop.f32.mrb[7].mxu0  ;;  %v444_v41 = vrot.slane %v402_v40, %v3273_v6  ;;  %v452_v42 = vrot.slane %v402_v40, %v3276_v7 }
 0x1f8   :  { %v2570_v59 = vsel %vm2506_vm4, %v1886_v44, %v2538_v51  ;;  %v2572_v60 = vsel %vm2508_vm5, %v1927_v45, %v2540_v52  ;;  %2436 = vmatpush1.bf16.msra.mxu1 %v3017_v36  ;;  %2477 = vmatpush1.bf16.msra.mxu0 %v3019_v37  ;;  %v456_v44 = vrot.slane %v402_v40, %v3284_v11 }
 0x1f9   :  { %v2633_v63 = vcombine.low %v2569_v53, %v2570_v59  ;;  %v2634_v14 = vcombine.low %v2571_v54, %v2572_v60  ;;  %2437 = vmatprep.subr.bf16.mxu1 %v3050_v43  ;;  %2478 = vmatprep.subr.bf16.mxu0 %v3052_v48  ;;  %v448_v43 = vrot.slane %v402_v40, %v3281_v10 }
 0x1fb   :  { %v2641_v0 = vrot.slane %v2633_v63, %v3295_v55  ;;  %v2648_v1 = vrot.slane %v2634_v14, %v3295_v55 }
 0x1fc   :  { %2438 = vmatpush1.bf16.msra.mxu1 %v3049_v58  ;;  %2479 = vmatpush1.bf16.msra.mxu0 %v3051_v62 }
 0x1fd   :  { %v2649_v2 = vcombine.low %v2641_v0, %v2648_v1 }
 0x1ff   :  { %2777 = vst [vmem:[%s3388_s5] sm:$0xff] %v2649_v2  ;;  %2456 = vmatmul.mubr.bf16.vlgmr.msra.gmra.mrb[28].mxu1 %v3240_v24  ;;  %2497 = vmatmul.mubr.bf16.vlgmr.msra.gmra.mrb[32].mxu0 %v3240_v24  ;;  %v432_v24 = vrot.slane %v3278_v9, %v3311_v5 }
 0x212   :  { %v1965_v16 = vpop.f32.mrb[4].mxu1  ;;  %v2006_v17 = vpop.f32.mrb[8].mxu0 }
 0x213   :  { %v1966_v18 = vadd.f32 %v1965_v16, %v428_v12  ;;  %v2007_v19 = vadd.f32 %v2006_v17, %v436_v13  ;;  %v1967_v20 = vpop.f32.mrb[5].mxu1  ;;  %v2008_v21 = vpop.f32.mrb[9].mxu0  ;;  %v460_v16 = vrot.slane %v402_v40, %v3305_v3  ;;  %v468_v17 = vrot.slane %v402_v40, %v3308_v4 }
 0x214   :  { %v1968_v61 = vadd.f32 %v1967_v20, %v432_v24  ;;  %v2009_v22 = vadd.f32 %v2008_v21, %v440_v15  ;;  %v1969_v23 = vpop.f32.mrb[6].mxu1  ;;  %v2010_v25 = vpop.f32.mrb[10].mxu0 }
 0x215   :  { %vm2509_vm6 = vcmp.gt.f32.partialorder %v1966_v18, 0.0  ;;  %v2541_v26 = vmul.f32 0.1, %v1966_v18  ;;  %vm2511_vm7 = vcmp.gt.f32.partialorder %v2007_v19, 0.0  ;;  %v2543_v27 = vmul.f32 0.1, %v2007_v19 }
 0x216   :  { %vm2510_vm8 = vcmp.gt.f32.partialorder %v1968_v61, 0.0  ;;  %v2542_v28 = vmul.f32 0.1, %v1968_v61  ;;  %vm2512_vm9 = vcmp.gt.f32.partialorder %v2009_v22, 0.0  ;;  %v2544_v29 = vmul.f32 0.1, %v2009_v22 }
 0x217   :  { %v2573_v30 = vsel %vm2509_vm6, %v1966_v18, %v2541_v26  ;;  %v2575_v9 = vsel %vm2511_vm7, %v2007_v19, %v2543_v27  ;;  %v1970_v31 = vpop.f32.mrb[7].mxu1  ;;  %v2011_v32 = vpop.f32.mrb[11].mxu0  ;;  %v464_v18 = vrot.slane %v402_v40, %v3311_v5  ;;  %v472_v19 = vrot.slane %v402_v40, %v3314_v8 }
 0x218   :  { %v2574_v33 = vsel %vm2510_vm8, %v1968_v61, %v2542_v28  ;;  %v2576_v34 = vsel %vm2512_vm9, %v2009_v22, %v2544_v29 }
 0x219   :  { %v2650_v35 = vcombine.low %v2573_v30, %v2574_v33  ;;  %v2651_v36 = vcombine.low %v2575_v9, %v2576_v34 }
 0x21b   :  { %v2658_v37 = vrot.slane %v2650_v35, %v3295_v55  ;;  %v2665_v38 = vrot.slane %v2651_v36, %v3295_v55 }
 0x21d   :  { %v2666_v39 = vcombine.low %v2658_v37, %v2665_v38 }
 0x21f   :  { %2778 = vst [vmem:[%s3388_s5 + $0x8] sm:$0xff] %v2666_v39 }
 0x232   :  { %v2047_v45 = vpop.f32.mrb[8].mxu1  ;;  %v2088_v46 = vpop.f32.mrb[12].mxu0 }
 0x233   :  { %v2048_v47 = vadd.f32 %v2047_v45, %v444_v41  ;;  %v2089_v48 = vadd.f32 %v2088_v46, %v452_v42  ;;  %v2049_v49 = vpop.f32.mrb[9].mxu1  ;;  %v2090_v50 = vpop.f32.mrb[13].mxu0 }
 0x234   :  { %v2050_v51 = vadd.f32 %v2049_v49, %v448_v43  ;;  %v2091_v52 = vadd.f32 %v2090_v50, %v456_v44  ;;  %v2051_v53 = vpop.f32.mrb[10].mxu1  ;;  %v2092_v54 = vpop.f32.mrb[14].mxu0  ;;  %v403_v44 = vld [vmem:[#allocation6 + $0x10] sm:$0xff] }
 0x235   :  { %vm2513_vm10 = vcmp.gt.f32.partialorder %v2048_v47, 0.0  ;;  %v2545_v56 = vmul.f32 0.1, %v2048_v47  ;;  %vm2515_vm11 = vcmp.gt.f32.partialorder %v2089_v48, 0.0  ;;  %v2547_v57 = vmul.f32 0.1, %v2089_v48 }
 0x236   :  { %vm2514_vm12 = vcmp.gt.f32.partialorder %v2050_v51, 0.0  ;;  %v2546_v58 = vmul.f32 0.1, %v2050_v51  ;;  %vm2516_vm13 = vcmp.gt.f32.partialorder %v2091_v52, 0.0  ;;  %v2548_v59 = vmul.f32 0.1, %v2091_v52 }
 0x237   :  { %v2577_v60 = vsel %vm2513_vm10, %v2048_v47, %v2545_v56  ;;  %v2579_v62 = vsel %vm2515_vm11, %v2089_v48, %v2547_v57  ;;  %v2052_v63 = vpop.f32.mrb[11].mxu1  ;;  %v2093_v14 = vpop.f32.mrb[15].mxu0  ;;  %v476_v45 = vrot.slane %v403_v44, %v3273_v6  ;;  %v484_v46 = vrot.slane %v403_v44, %v3276_v7 }
 0x238   :  { %v2578_v0 = vsel %vm2514_vm12, %v2050_v51, %v2546_v58  ;;  %v2580_v1 = vsel %vm2516_vm13, %v2091_v52, %v2548_v59  ;;  %v480_v47 = vrot.slane %v403_v44, %v3281_v10  ;;  %v488_v48 = vrot.slane %v403_v44, %v3284_v11 }
 0x239   :  { %v2667_v2 = vcombine.low %v2577_v60, %v2578_v0  ;;  %v2668_v12 = vcombine.low %v2579_v62, %v2580_v1 }
 0x23b   :  { %v2675_v13 = vrot.slane %v2667_v2, %v3295_v55  ;;  %v2682_v24 = vrot.slane %v2668_v12, %v3295_v55 }
 0x23d   :  { %v2683_v15 = vcombine.low %v2675_v13, %v2682_v24 }
 0x23f   :  { %2779 = vst [vmem:[%s3388_s5 + $0x10] sm:$0xff] %v2683_v15 }
 0x252   :  { %v2129_v20 = vpop.f32.mrb[12].mxu1  ;;  %v2170_v21 = vpop.f32.mrb[16].mxu0 }
 0x253   :  { %v2130_v61 = vadd.f32 %v2129_v20, %v460_v16  ;;  %v2171_v22 = vadd.f32 %v2170_v21, %v468_v17  ;;  %v2131_v23 = vpop.f32.mrb[13].mxu1  ;;  %v2172_v25 = vpop.f32.mrb[17].mxu0  ;;  %v492_v20 = vrot.slane %v403_v44, %v3305_v3  ;;  %v500_v21 = vrot.slane %v403_v44, %v3308_v4 }
 0x254   :  { %v2132_v26 = vadd.f32 %v2131_v23, %v464_v18  ;;  %v2173_v27 = vadd.f32 %v2172_v25, %v472_v19  ;;  %v2133_v28 = vpop.f32.mrb[14].mxu1  ;;  %v2174_v29 = vpop.f32.mrb[18].mxu0 }
 0x255   :  { %vm2517_vm14 = vcmp.gt.f32.partialorder %v2130_v61, 0.0  ;;  %v2549_v30 = vmul.f32 0.1, %v2130_v61  ;;  %vm2519_vm15 = vcmp.gt.f32.partialorder %v2171_v22, 0.0  ;;  %v2551_v9 = vmul.f32 0.1, %v2171_v22 }
 0x256   :  { %vm2518_vm0 = vcmp.gt.f32.partialorder %v2132_v26, 0.0  ;;  %v2550_v31 = vmul.f32 0.1, %v2132_v26  ;;  %vm2520_vm1 = vcmp.gt.f32.partialorder %v2173_v27, 0.0  ;;  %v2552_v32 = vmul.f32 0.1, %v2173_v27 }
 0x257   :  { %v2581_v33 = vsel %vm2517_vm14, %v2130_v61, %v2549_v30  ;;  %v2583_v34 = vsel %vm2519_vm15, %v2171_v22, %v2551_v9  ;;  %v2134_v35 = vpop.f32.mrb[15].mxu1  ;;  %v2175_v36 = vpop.f32.mrb[19].mxu0  ;;  %v496_v61 = vrot.slane %v403_v44, %v3311_v5  ;;  %v504_v22 = vrot.slane %v403_v44, %v3314_v8 }
 0x258   :  { %v2582_v37 = vsel %vm2518_vm0, %v2132_v26, %v2550_v31  ;;  %v2584_v38 = vsel %vm2520_vm1, %v2173_v27, %v2552_v32 }
 0x259   :  { %v2684_v39 = vcombine.low %v2581_v33, %v2582_v37  ;;  %v2685_v40 = vcombine.low %v2583_v34, %v2584_v38 }
 0x25b   :  { %v2692_v41 = vrot.slane %v2684_v39, %v3295_v55  ;;  %v2699_v42 = vrot.slane %v2685_v40, %v3295_v55 }
 0x25d   :  { %v2700_v43 = vcombine.low %v2692_v41, %v2699_v42 }
 0x25f   :  { %2780 = vst [vmem:[%s3388_s5 + $0x18] sm:$0xff] %v2700_v43 }
 0x272   :  { %v2211_v49 = vpop.f32.mrb[16].mxu1  ;;  %v2252_v50 = vpop.f32.mrb[20].mxu0 }
 0x273   :  { %v2212_v51 = vadd.f32 %v2211_v49, %v476_v45  ;;  %v2253_v52 = vadd.f32 %v2252_v50, %v484_v46  ;;  %v2213_v53 = vpop.f32.mrb[17].mxu1  ;;  %v2254_v54 = vpop.f32.mrb[21].mxu0 }
 0x274   :  { %v2214_v56 = vadd.f32 %v2213_v53, %v480_v47  ;;  %v2255_v57 = vadd.f32 %v2254_v54, %v488_v48  ;;  %v2215_v58 = vpop.f32.mrb[18].mxu1  ;;  %v2256_v59 = vpop.f32.mrb[22].mxu0  ;;  %v404_v48 = vld [vmem:[#allocation6 + $0x18] sm:$0xff] }
 0x275   :  { %vm2521_vm2 = vcmp.gt.f32.partialorder %v2212_v51, 0.0  ;;  %v2553_v60 = vmul.f32 0.1, %v2212_v51  ;;  %vm2523_vm3 = vcmp.gt.f32.partialorder %v2253_v52, 0.0  ;;  %v2555_v62 = vmul.f32 0.1, %v2253_v52 }
 0x276   :  { %vm2522_vm4 = vcmp.gt.f32.partialorder %v2214_v56, 0.0  ;;  %v2554_v63 = vmul.f32 0.1, %v2214_v56  ;;  %vm2524_vm5 = vcmp.gt.f32.partialorder %v2255_v57, 0.0  ;;  %v2556_v14 = vmul.f32 0.1, %v2255_v57 }
 0x277   :  { %v2585_v0 = vsel %vm2521_vm2, %v2212_v51, %v2553_v60  ;;  %v2587_v1 = vsel %vm2523_vm3, %v2253_v52, %v2555_v62  ;;  %v2216_v2 = vpop.f32.mrb[19].mxu1  ;;  %v2257_v12 = vpop.f32.mrb[23].mxu0  ;;  %v508_v49 = vrot.slane %v404_v48, %v3273_v6  ;;  %v516_v50 = vrot.slane %v404_v48, %v3276_v7 }
 0x278   :  { %v2586_v13 = vsel %vm2522_vm4, %v2214_v56, %v2554_v63  ;;  %v2588_v24 = vsel %vm2524_vm5, %v2255_v57, %v2556_v14  ;;  %v512_v51 = vrot.slane %v404_v48, %v3281_v10  ;;  %v520_v52 = vrot.slane %v404_v48, %v3284_v11 }
 0x279   :  { %v2701_v15 = vcombine.low %v2585_v0, %v2586_v13  ;;  %v2702_v16 = vcombine.low %v2587_v1, %v2588_v24 }
 0x27b   :  { %v2709_v17 = vrot.slane %v2701_v15, %v3295_v55  ;;  %v2716_v18 = vrot.slane %v2702_v16, %v3295_v55 }
 0x27d   :  { %v2717_v19 = vcombine.low %v2709_v17, %v2716_v18 }
 0x27f   :  { %2781 = vst [vmem:[%s3388_s5 + $0x20] sm:$0xff] %v2717_v19 }
 0x292   :  { %v2293_v23 = vpop.f32.mrb[20].mxu1  ;;  %v2334_v25 = vpop.f32.mrb[24].mxu0 }
 0x293   :  { %v2294_v26 = vadd.f32 %v2293_v23, %v492_v20  ;;  %v2335_v27 = vadd.f32 %v2334_v25, %v500_v21  ;;  %v2295_v28 = vpop.f32.mrb[21].mxu1  ;;  %v2336_v29 = vpop.f32.mrb[25].mxu0  ;;  %v524_v20 = vrot.slane %v404_v48, %v3305_v3  ;;  %v532_v21 = vrot.slane %v404_v48, %v3308_v4 }
 0x294   :  { %v2296_v30 = vadd.f32 %v2295_v28, %v496_v61  ;;  %v2337_v9 = vadd.f32 %v2336_v29, %v504_v22  ;;  %v2297_v31 = vpop.f32.mrb[22].mxu1  ;;  %v2338_v32 = vpop.f32.mrb[26].mxu0  ;;  %v528_v61 = vrot.slane %v404_v48, %v3311_v5  ;;  %v536_v22 = vrot.slane %v404_v48, %v3314_v8 }
 0x295   :  { %vm2525_vm6 = vcmp.gt.f32.partialorder %v2294_v26, 0.0  ;;  %v2557_v33 = vmul.f32 0.1, %v2294_v26  ;;  %vm2527_vm7 = vcmp.gt.f32.partialorder %v2335_v27, 0.0  ;;  %v2559_v34 = vmul.f32 0.1, %v2335_v27 }
 0x296   :  { %vm2526_vm8 = vcmp.gt.f32.partialorder %v2296_v30, 0.0  ;;  %v2558_v35 = vmul.f32 0.1, %v2296_v30  ;;  %vm2528_vm9 = vcmp.gt.f32.partialorder %v2337_v9, 0.0  ;;  %v2560_v36 = vmul.f32 0.1, %v2337_v9 }
 0x297   :  { %v2589_v37 = vsel %vm2525_vm6, %v2294_v26, %v2557_v33  ;;  %v2591_v38 = vsel %vm2527_vm7, %v2335_v27, %v2559_v34  ;;  %v2298_v39 = vpop.f32.mrb[23].mxu1  ;;  %v2339_v40 = vpop.f32.mrb[27].mxu0 }
 0x298   :  { %v2590_v41 = vsel %vm2526_vm8, %v2296_v30, %v2558_v35  ;;  %v2592_v42 = vsel %vm2528_vm9, %v2337_v9, %v2560_v36 }
 0x299   :  { %v2718_v43 = vcombine.low %v2589_v37, %v2590_v41  ;;  %v2719_v44 = vcombine.low %v2591_v38, %v2592_v42 }
 0x29b   :  { %v2726_v45 = vrot.slane %v2718_v43, %v3295_v55  ;;  %v2733_v46 = vrot.slane %v2719_v44, %v3295_v55 }
 0x29d   :  { %v2734_v47 = vcombine.low %v2726_v45, %v2733_v46 }
 0x29f   :  { %2782 = vst [vmem:[%s3388_s5 + $0x28] sm:$0xff] %v2734_v47 }
 0x2b2   :  { %v2375_v53 = vpop.f32.mrb[24].mxu1  ;;  %v2416_v54 = vpop.f32.mrb[28].mxu0 }
 0x2b3   :  { %v2376_v56 = vadd.f32 %v2375_v53, %v508_v49  ;;  %v2417_v57 = vadd.f32 %v2416_v54, %v516_v50  ;;  %v2377_v58 = vpop.f32.mrb[25].mxu1  ;;  %v2418_v59 = vpop.f32.mrb[29].mxu0 }
 0x2b4   :  { %v2378_v60 = vadd.f32 %v2377_v58, %v512_v51  ;;  %v2419_v62 = vadd.f32 %v2418_v59, %v520_v52  ;;  %v2379_v63 = vpop.f32.mrb[26].mxu1  ;;  %v2420_v14 = vpop.f32.mrb[30].mxu0 }
 0x2b5   :  { %vm2529_vm10 = vcmp.gt.f32.partialorder %v2376_v56, 0.0  ;;  %v2561_v0 = vmul.f32 0.1, %v2376_v56  ;;  %vm2531_vm11 = vcmp.gt.f32.partialorder %v2417_v57, 0.0  ;;  %v2563_v6 = vmul.f32 0.1, %v2417_v57 }
 0x2b6   :  { %vm2530_vm12 = vcmp.gt.f32.partialorder %v2378_v60, 0.0  ;;  %v2562_v7 = vmul.f32 0.1, %v2378_v60  ;;  %vm2532_vm13 = vcmp.gt.f32.partialorder %v2419_v62, 0.0  ;;  %v2564_v10 = vmul.f32 0.1, %v2419_v62 }
 0x2b7   :  { %v2593_v1 = vsel %vm2529_vm10, %v2376_v56, %v2561_v0  ;;  %v2595_v11 = vsel %vm2531_vm11, %v2417_v57, %v2563_v6  ;;  %v2380_v2 = vpop.f32.mrb[27].mxu1  ;;  %v2421_v12 = vpop.f32.mrb[31].mxu0 }
 0x2b8   :  { %v2594_v13 = vsel %vm2530_vm12, %v2378_v60, %v2562_v7  ;;  %v2596_v24 = vsel %vm2532_vm13, %v2419_v62, %v2564_v10 }
 0x2b9   :  { %v2735_v15 = vcombine.low %v2593_v1, %v2594_v13  ;;  %v2736_v16 = vcombine.low %v2595_v11, %v2596_v24 }
 0x2bb   :  { %v2743_v17 = vrot.slane %v2735_v15, %v3295_v55  ;;  %v2750_v18 = vrot.slane %v2736_v16, %v3295_v55 }
 0x2bd   :  { %v2751_v19 = vcombine.low %v2743_v17, %v2750_v18 }
 0x2bf   :  { %2783 = vst [vmem:[%s3388_s5 + $0x30] sm:$0xff] %v2751_v19 }
 0x2d2   :  { %v2457_v23 = vpop.f32.mrb[28].mxu1  ;;  %v2498_v25 = vpop.f32.mrb[32].mxu0 }
 0x2d3   :  { %v2458_v26 = vadd.f32 %v2457_v23, %v524_v20  ;;  %v2499_v27 = vadd.f32 %v2498_v25, %v532_v21  ;;  %v2459_v28 = vpop.f32.mrb[29].mxu1  ;;  %v2500_v29 = vpop.f32.mrb[33].mxu0 }
 0x2d4   :  { %v2460_v30 = vadd.f32 %v2459_v28, %v528_v61  ;;  %v2501_v9 = vadd.f32 %v2500_v29, %v536_v22  ;;  %v2461_v31 = vpop.f32.mrb[30].mxu1  ;;  %v2502_v32 = vpop.f32.mrb[34].mxu0 }
 0x2d5   :  { %vm2533_vm14 = vcmp.gt.f32.partialorder %v2458_v26, 0.0  ;;  %v2565_v33 = vmul.f32 0.1, %v2458_v26  ;;  %vm2535_vm15 = vcmp.gt.f32.partialorder %v2499_v27, 0.0  ;;  %v2567_v3 = vmul.f32 0.1, %v2499_v27 }
 0x2d6   :  { %vm2534_vm0 = vcmp.gt.f32.partialorder %v2460_v30, 0.0  ;;  %v2566_v4 = vmul.f32 0.1, %v2460_v30  ;;  %vm2536_vm1 = vcmp.gt.f32.partialorder %v2501_v9, 0.0  ;;  %v2568_v5 = vmul.f32 0.1, %v2501_v9 }
 0x2d7   :  { %v2597_v34 = vsel %vm2533_vm14, %v2458_v26, %v2565_v33  ;;  %v2599_v8 = vsel %vm2535_vm15, %v2499_v27, %v2567_v3  ;;  %v2462_v35 = vpop.f32.mrb[31].mxu1  ;;  %v2503_v36 = vpop.f32.mrb[35].mxu0 }
 0x2d8   :  { %v2598_v37 = vsel %vm2534_vm0, %v2460_v30, %v2566_v4  ;;  %v2600_v38 = vsel %vm2536_vm1, %v2501_v9, %v2568_v5 }
 0x2d9   :  { %v2752_v39 = vcombine.low %v2597_v34, %v2598_v37  ;;  %v2753_v40 = vcombine.low %v2599_v8, %v2600_v38 }
 0x2db   :  { %v2760_v41 = vrot.slane %v2752_v39, %v3295_v55  ;;  %v2767_v42 = vrot.slane %v2753_v40, %v3295_v55 }
 0x2dd   :  { %v2768_v43 = vcombine.low %v2760_v41, %v2767_v42 }
 0x2df   :  { %2784 = vst [vmem:[%s3388_s5 + $0x38] sm:$0xff] %v2768_v43 }
 0x2e0   :  { %2789 = vsyncpa [#allocation3], 1 }
 0x2e1   :  { %2790 = vsyncpa [#allocation5], 1 }

</bundles_post_ra>
